<compile_context>
chip_gen: v7x
topology: tpu7x:2x2x1
jax: 0.10.0
libtpu: 0.0.40
codegen_flags: <defaults>
</compile_context>

<pallas_src>
import math

import numpy as np
import jax
import jax.numpy as jnp
from jax.experimental import pallas as pl
from jax.experimental.pallas import tpu as pltpu

SQRT2 = math.sqrt(2.0)
PI = math.pi


# ----------------------------------------------------------------------------
# Parameter construction (pure numpy, float64, cast to float32 at the end).
# Mirrors normCm / dltWeightsDH / idctMatrix / idstMatrix / generateLittleHalf
# / wignerCoeffs of the PyTorch module.
# ----------------------------------------------------------------------------
def norm_cm(B):
    Cm = np.zeros(2 * B - 1, dtype=np.float64)
    for m in range(-(B - 1), B):
        Cm[m + (B - 1)] = ((-1.0) ** m) * math.sqrt(2.0 * PI)
    return Cm


def dlt_weights_dh(B):
    W = np.zeros(2 * B, dtype=np.float64)
    for k in range(2 * B):
        C = 2.0 / B * math.sin(PI * (2 * k + 1) / (4.0 * B))
        wk = 0.0
        for p in range(B):
            wk += 1.0 / (2 * p + 1) * math.sin((2 * k + 1) * (2 * p + 1) * PI / (4.0 * B))
        W[k] = C * wk
    return W


def idct_matrix(N):
    DI = np.zeros((N, N), dtype=np.float64)
    for k in range(N):
        for n in range(N):
            DI[k, n] = math.cos(PI * n * (k + 0.5) / N)
    DI[:, 0] *= math.sqrt(1.0 / N)
    DI[:, 1:] *= math.sqrt(2.0 / N)
    return DI


def idst_matrix(N):
    DI = np.zeros((N, N), dtype=np.float64)
    for k in range(N):
        for n in range(N):
            if n == N - 1:
                DI[k, n] = (-1.0) ** k
            else:
                DI[k, n] = math.sin(PI * (n + 1) * (k + 0.5) / N)
    DI[:, N - 1] *= math.sqrt(1.0 / N)
    DI[:, : N - 1] *= math.sqrt(2.0 / N)
    return DI


def tri_half_recur(l, m, n):
    denom = (-1 + l) * math.sqrt((l - m) * (l + m) * (l - n) * (l + n))
    c1 = (1 - 2 * l) * m * n / denom
    c2 = -1.0 * l * math.sqrt(((l - 1) ** 2 - m * m) * ((l - 1) ** 2 - n * n)) / denom
    return c1, c2


def generate_little_half(B):
    d = np.zeros((B, 2 * B - 1, 2 * B - 1), dtype=np.float64)
    d[0, B - 1, B - 1] = 1.0
    if B > 1:
        d[1, B - 2, B - 2] = 0.5
        d[1, B - 2, B - 1] = 1.0 / SQRT2
        d[1, B - 2, B] = 0.5
        d[1, B - 1, B - 2] = -1.0 / SQRT2
        d[1, B - 1, B] = 1.0 / SQRT2
        d[1, B, B - 2] = 0.5
        d[1, B, B - 1] = -1.0 / SQRT2
        d[1, B, B] = 0.5
    for l in range(2, B):
        for m in range(0, l):
            for n in range(0, l):
                if m == 0 and n == 0:
                    d[l, B - 1, B - 1] = -1.0 * ((l - 1) / l) * d[l - 2, B - 1, B - 1]
                else:
                    c1, c2 = tri_half_recur(l, m, n)
                    d[l, m + B - 1, n + B - 1] = (
                        c1 * d[l - 1, m + B - 1, n + B - 1]
                        + c2 * d[l - 2, m + B - 1, n + B - 1]
                    )
        for m in range(0, l + 1):
            lnV = (
                0.5
                * (math.lgamma(2 * l + 1) - math.lgamma(l + m + 1) - math.lgamma(l - m + 1))
                - l * math.log(2.0)
            )
            d[l, m + B - 1, l + B - 1] = math.exp(lnV)
            d[l, l + B - 1, m + B - 1] = ((-1.0) ** (l - m)) * math.exp(lnV)
        for m in range(0, l + 1):
            for n in range(0, l + 1):
                val = d[l, m + B - 1, n + B - 1]
                if m != 0 or n != 0:
                    d[l, -m + B - 1, -n + B - 1] = ((-1.0) ** (m - n)) * val
                    d[l, -m + B - 1, n + B - 1] = ((-1.0) ** (l - n)) * val
                    d[l, m + B - 1, -n + B - 1] = ((-1.0) ** (l + m)) * val
    return d


def wigner_coeffs_dense(B):
    """Dense version of sparse wignerCoeffs(B): (B*(2B-1), 2B*(2B-1)), block-diag over m."""
    d = generate_little_half(B)
    N = 2 * B
    D = np.zeros((B * (2 * B - 1), 2 * B * (2 * B - 1)), dtype=np.float64)
    H = 0
    W = 0
    for m in range(-(B - 1), B):
        for l in range(abs(m), B):
            for n in range(0, l + 1):
                iH = l + H
                iW = n + W
                if m % 2 == 0:
                    if n == 0:
                        c = math.sqrt((2 * l + 1) / 2.0) * math.sqrt(N)
                    else:
                        c = math.sqrt((2 * l + 1) / 2.0) * math.sqrt(2.0 * N)
                    if m % 4 == 2:
                        c *= -1.0
                    coeff = c * d[l, n + B - 1, -m + B - 1] * d[l, n + B - 1, B - 1]
                elif n == l:
                    coeff = 0.0
                else:
                    c = math.sqrt((2 * l + 1) / 2.0) * math.sqrt(2.0 * N)
                    if m % 4 == 1:
                        c *= -1.0
                    coeff = c * d[l, n + 1 + B - 1, -m + B - 1] * d[l, n + 1 + B - 1, B - 1]
                if abs(coeff) > 1e-15:
                    D[iH, iW] = coeff
        H += B
        W += N
    return D


def build_ftsht_params(B):
    nrows = 2 * B - 1
    N = 2 * B

    D = wigner_coeffs_dense(B)                     # (B*nrows, N*nrows)
    Wd = dlt_weights_dh(B)
    xf_c = np.diag(Wd) @ idct_matrix(N)            # weightedDCST(B,'c'): x -> x @ xf_c
    xf_s = np.diag(Wd) @ idst_matrix(N)            # weightedDCST(B,'s'): x -> x @ xf_s
    cm = norm_cm(B)

    if (B - 1) % 2 == 1:
        c_ind = np.arange(1, nrows, 2)
        s_ind = np.arange(0, nrows, 2)
    else:
        s_ind = np.arange(1, nrows, 2)
        c_ind = np.arange(0, nrows, 2)

    # Fold Cm, the DCT/DST and the nonzero Wigner block into one per-m matrix:
    #   out[:, m, :] = x[:, m, :] @ A[m],   A[m] = Cm[m] * T_m @ D_m^T   (2B, B)
    c_set = set(int(i) for i in c_ind)
    A = np.zeros((nrows, N, B), dtype=np.float64)
    for m in range(nrows):
        Dm = D[m * B:(m + 1) * B, m * N:(m + 1) * N]       # (B, 2B) nonzero block
        Tm = xf_c if m in c_set else xf_s
        A[m] = cm[m] * (Tm @ Dm.T)

    return {
        "B": B,
        "A": jnp.asarray(A, jnp.float32),
        # pieces for the pure-JAX reference (mirrors the torch code step by step)
        "D": jnp.asarray(D, jnp.float32),
        "xf_c": jnp.asarray(xf_c, jnp.float32),
        "xf_s": jnp.asarray(xf_s, jnp.float32),
        "cm": jnp.asarray(cm, jnp.float32),
        "c_ind": jnp.asarray(c_ind, jnp.int32),
        "s_ind": jnp.asarray(s_ind, jnp.int32),
    }


# ----------------------------------------------------------------------------
# Pallas kernel: one grid step handles TM consecutive m rows for a TB-row
# batch tile.  x is fed in m-major layout (TM, TB, 2B); A is (TM, 2B, B);
# the output block is batch-major and lane-dense: (TB, TM*B).
# ----------------------------------------------------------------------------
def fdlt_kernel(x_ref, a_ref, out_ref):
    tm = a_ref.shape[0]
    Bc = a_ref.shape[2]
    for i in range(tm):   # static unroll: one small MXU matmul per m row in the tile
        y = jnp.dot(x_ref[i], a_ref[i], preferred_element_type=jnp.float32)
        out_ref[:, i * Bc:(i + 1) * Bc] = y.astype(out_ref.dtype)


def _round_up(x, n):
    return ((x + n - 1) // n) * n


def ftsht_forward(psi, params):
    """psi: (b, 2B, 2B) real float32 (or complex64) -> Psi: (b, 2B-1, B) complex64."""
    B = params["B"]
    nrows = 2 * B - 1
    N = 2 * B
    b = psi.shape[0]

    # TODO(synk): the length-2B FFT (torch.fft.fft + fftshift) stays in XLA via
    # jnp.fft — there is no Pallas FFT primitive; the heavy FDLT stage below is
    # the Pallas kernel.
    psi_hat = jnp.fft.fftshift(jnp.fft.fft(psi, axis=1), axes=1)[:, 1:, :] / N   # norm='forward'

    # Real/imag stacked along the batch axis (first b rows = Re, next b = Im).
    xb = jnp.concatenate([jnp.real(psi_hat), jnp.imag(psi_hat)], axis=0)
    xb = xb.astype(jnp.float32)                                   # (2b, nrows, 2B)
    bb = 2 * b

    # ---- tile selection -----------------------------------------------------
    TB = 256 if bb >= 256 else _round_up(bb, 8)                   # batch tile (sublane mult of 8)
    bb_pad = _round_up(bb, TB)
    m_align = 128 // math.gcd(B, 128)                             # makes TM*B a multiple of 128
    bytes_per_m = 4 * (TB * N + N * B + TB * B)                   # x + A + out per m row
    budget = 6 * 1024 * 1024                                      # ~6 MiB/step (x2 double-buffer)
    k = max(1, budget // (bytes_per_m * m_align))
    TM = min(m_align * k, _round_up(nrows, m_align))
    nrows_pad = _round_up(nrows, TM)

    # ---- m-major layout + zero padding (padded rows produce zeros, sliced off)
    x_mm = jnp.transpose(xb, (1, 0, 2))                           # (nrows, 2b, 2B)
    x_mm = jnp.pad(x_mm, ((0, nrows_pad - nrows), (0, bb_pad - bb), (0, 0)))
    A = jnp.pad(params["A"], ((0, nrows_pad - nrows), (0, 0), (0, 0)))

    grid = (bb_pad // TB, nrows_pad // TM)
    out_flat = pl.pallas_call(
        fdlt_kernel,
        out_shape=jax.ShapeDtypeStruct((bb_pad, nrows_pad * B), jnp.float32),
        grid=grid,
        in_specs=[
            pl.BlockSpec((TM, TB, N), lambda bi, mi: (mi, bi, 0)),   # x, m-major
            pl.BlockSpec((TM, N, B), lambda bi, mi: (mi, 0, 0)),     # folded per-m matrices
        ],
        out_specs=pl.BlockSpec((TB, TM * B), lambda bi, mi: (bi, mi)),  # lane-dense, batch-major
        compiler_params=pltpu.CompilerParams(
            dimension_semantics=("parallel", "parallel"),
            vmem_limit_bytes=64 * 1024 * 1024,
        ),
    )(x_mm, A)

    out = out_flat.reshape(bb_pad, nrows_pad, B)[:bb, :nrows, :]    # free reshape + slice
    return out[:b] + 1j * out[b:]                                    # (b, 2B-1, B) complex64


# ----------------------------------------------------------------------------
# Pure-JAX reference that mirrors the PyTorch FTSHT/FDLT code step by step.
# ----------------------------------------------------------------------------
def ftsht_reference(psi, params):
    B = params["B"]
    nrows = 2 * B - 1
    N = 2 * B
    b = psi.shape[0]

    psi_hat = jnp.fft.fftshift(jnp.fft.fft(psi, axis=1), axes=1)[:, 1:, :] / N
    x = jnp.stack([jnp.real(psi_hat), jnp.imag(psi_hat)], axis=1)      # (b, 2, nrows, 2B)
    x = x.reshape(2 * b, nrows, N).astype(jnp.float32)

    x = params["cm"][None, :, None] * x
    xc = jnp.matmul(x[:, params["c_ind"], :], params["xf_c"])
    xs = jnp.matmul(x[:, params["s_ind"], :], params["xf_s"])
    x = x.at[:, params["c_ind"], :].set(xc)
    x = x.at[:, params["s_ind"], :].set(xs)

    flat = x.reshape(2 * b, N * nrows).T                               # (2B(2B-1), 2b)
    out = (params["D"] @ flat).reshape(nrows, B, 2 * b)
    out = jnp.transpose(out, (2, 0, 1))                                # (2b, nrows, B)
    out = out.reshape(b, 2, nrows, B).transpose(0, 2, 3, 1)            # (b, nrows, B, 2)
    return out[..., 0] + 1j * out[..., 1]


if __name__ == "__main__":
    B = 4                       # bandlimit -> psi: (batch, 2B, 2B) = (2, 8, 8)
    batch = 2

    params = build_ftsht_params(B)

    key = jax.random.PRNGKey(0)
    psi = jax.random.normal(key, (batch, 2 * B, 2 * B), dtype=jnp.float32)

    out = ftsht_forward(psi, params)
    out = jax.block_until_ready(out)

    ref = jax.block_until_ready(ftsht_reference(psi, params))

    assert out.shape == (batch, 2 * B - 1, B)
    assert jnp.iscomplexobj(out)
    max_err = float(jnp.max(jnp.abs(out - ref)))
    scale = float(jnp.max(jnp.abs(ref))) + 1e-12
    if max_err / scale > 5e-3:
        raise AssertionError(f"Pallas output mismatch: rel err {max_err / scale:.3e}")

    print("KERNEL_OK")
</pallas_src>

<mosaic_0001>
module attributes {stable_mosaic.version = 11 : i64} {
  func.func @fdlt_kernel(%arg0: i32, %arg1: i32, %arg2: memref<32x8x8xf32, #tpu.memory_space<vmem>>, %arg3: memref<32x8x4xf32, #tpu.memory_space<vmem>>, %arg4: memref<8x128xf32, #tpu.memory_space<vmem>>) attributes {dimension_semantics = [#tpu.dimension_semantics<parallel>, #tpu.dimension_semantics<parallel>], iteration_bounds = array<i64: 1, 1>, scalar_prefetch = 0 : i64, scratch_operands = 0 : i64, tpu.core_type = #tpu.core_type<tc>, window_params = [{transform_indices = @transform_0, window_bounds = array<i64: 32, 8, 8>}, {transform_indices = @transform_1, window_bounds = array<i64: 32, 8, 4>}, {transform_indices = @transform_2, window_bounds = array<i64: 8, 128>}]} {
    %c0 = arith.constant 0 : index
    %c0_0 = arith.constant 0 : index
    %c0_1 = arith.constant 0 : index
    %0 = vector.load %arg2[%c0, %c0_0, %c0_1] : memref<32x8x8xf32, #tpu.memory_space<vmem>>, vector<1x8x8xf32>
    %1 = vector.shape_cast %0 : vector<1x8x8xf32> to vector<8x8xf32>
    %c0_2 = arith.constant 0 : index
    %c0_3 = arith.constant 0 : index
    %c0_4 = arith.constant 0 : index
    %2 = vector.load %arg3[%c0_2, %c0_3, %c0_4] : memref<32x8x4xf32, #tpu.memory_space<vmem>>, vector<1x8x4xf32>
    %3 = vector.shape_cast %2 : vector<1x8x4xf32> to vector<8x4xf32>
    %cst = arith.constant dense<0.000000e+00> : vector<8x4xf32>
    %4 = tpu.matmul %1, %3, %cst {dimension_numbers = #tpu.dot_dimension_numbers<[1], [0], [0], [1], [0, 0, 1, 1], [], []>} : vector<8x8xf32>, vector<8x4xf32>, vector<8x4xf32> -> vector<8x4xf32>
    %c0_5 = arith.constant 0 : index
    %c0_6 = arith.constant 0 : index
    %5 = vector.load %arg4[%c0_5, %c0_6] : memref<8x128xf32, #tpu.memory_space<vmem>>, vector<8x4xf32>
    tpu.vector_store %arg4[%c0_5, %c0_6], %4 {strides = array<i32>} : memref<8x128xf32, #tpu.memory_space<vmem>>, vector<8x4xf32>,
    %c1 = arith.constant 1 : index
    %c0_7 = arith.constant 0 : index
    %c0_8 = arith.constant 0 : index
    %6 = vector.load %arg2[%c1, %c0_7, %c0_8] : memref<32x8x8xf32, #tpu.memory_space<vmem>>, vector<1x8x8xf32>
    %7 = vector.shape_cast %6 : vector<1x8x8xf32> to vector<8x8xf32>
    %c1_9 = arith.constant 1 : index
    %c0_10 = arith.constant 0 : index
    %c0_11 = arith.constant 0 : index
    %8 = vector.load %arg3[%c1_9, %c0_10, %c0_11] : memref<32x8x4xf32, #tpu.memory_space<vmem>>, vector<1x8x4xf32>
    %9 = vector.shape_cast %8 : vector<1x8x4xf32> to vector<8x4xf32>
    %cst_12 = arith.constant dense<0.000000e+00> : vector<8x4xf32>
    %10 = tpu.matmul %7, %9, %cst_12 {dimension_numbers = #tpu.dot_dimension_numbers<[1], [0], [0], [1], [0, 0, 1, 1], [], []>} : vector<8x8xf32>, vector<8x4xf32>, vector<8x4xf32> -> vector<8x4xf32>
    %c0_13 = arith.constant 0 : index
    %c4 = arith.constant 4 : index
    %11 = vector.load %arg4[%c0_13, %c4] : memref<8x128xf32, #tpu.memory_space<vmem>>, vector<8x4xf32>
    tpu.vector_store %arg4[%c0_13, %c4], %10 {strides = array<i32>} : memref<8x128xf32, #tpu.memory_space<vmem>>, vector<8x4xf32>,
    %c2 = arith.constant 2 : index
    %c0_14 = arith.constant 0 : index
    %c0_15 = arith.constant 0 : index
    %12 = vector.load %arg2[%c2, %c0_14, %c0_15] : memref<32x8x8xf32, #tpu.memory_space<vmem>>, vector<1x8x8xf32>
    %13 = vector.shape_cast %12 : vector<1x8x8xf32> to vector<8x8xf32>
    %c2_16 = arith.constant 2 : index
    %c0_17 = arith.constant 0 : index
    %c0_18 = arith.constant 0 : index
    %14 = vector.load %arg3[%c2_16, %c0_17, %c0_18] : memref<32x8x4xf32, #tpu.memory_space<vmem>>, vector<1x8x4xf32>
    %15 = vector.shape_cast %14 : vector<1x8x4xf32> to vector<8x4xf32>
    %cst_19 = arith.constant dense<0.000000e+00> : vector<8x4xf32>
    %16 = tpu.matmul %13, %15, %cst_19 {dimension_numbers = #tpu.dot_dimension_numbers<[1], [0], [0], [1], [0, 0, 1, 1], [], []>} : vector<8x8xf32>, vector<8x4xf32>, vector<8x4xf32> -> vector<8x4xf32>
    %c0_20 = arith.constant 0 : index
    %c8 = arith.constant 8 : index
    %17 = vector.load %arg4[%c0_20, %c8] : memref<8x128xf32, #tpu.memory_space<vmem>>, vector<8x4xf32>
    tpu.vector_store %arg4[%c0_20, %c8], %16 {strides = array<i32>} : memref<8x128xf32, #tpu.memory_space<vmem>>, vector<8x4xf32>,
    %c3 = arith.constant 3 : index
    %c0_21 = arith.constant 0 : index
    %c0_22 = arith.constant 0 : index
    %18 = vector.load %arg2[%c3, %c0_21, %c0_22] : memref<32x8x8xf32, #tpu.memory_space<vmem>>, vector<1x8x8xf32>
    %19 = vector.shape_cast %18 : vector<1x8x8xf32> to vector<8x8xf32>
    %c3_23 = arith.constant 3 : index
    %c0_24 = arith.constant 0 : index
    %c0_25 = arith.constant 0 : index
    %20 = vector.load %arg3[%c3_23, %c0_24, %c0_25] : memref<32x8x4xf32, #tpu.memory_space<vmem>>, vector<1x8x4xf32>
    %21 = vector.shape_cast %20 : vector<1x8x4xf32> to vector<8x4xf32>
    %cst_26 = arith.constant dense<0.000000e+00> : vector<8x4xf32>
    %22 = tpu.matmul %19, %21, %cst_26 {dimension_numbers = #tpu.dot_dimension_numbers<[1], [0], [0], [1], [0, 0, 1, 1], [], []>} : vector<8x8xf32>, vector<8x4xf32>, vector<8x4xf32> -> vector<8x4xf32>
    %c0_27 = arith.constant 0 : index
    %c12 = arith.constant 12 : index
    %23 = vector.load %arg4[%c0_27, %c12] : memref<8x128xf32, #tpu.memory_space<vmem>>, vector<8x4xf32>
    tpu.vector_store %arg4[%c0_27, %c12], %22 {strides = array<i32>} : memref<8x128xf32, #tpu.memory_space<vmem>>, vector<8x4xf32>,
    %c4_28 = arith.constant 4 : index
    %c0_29 = arith.constant 0 : index
    %c0_30 = arith.constant 0 : index
    %24 = vector.load %arg2[%c4_28, %c0_29, %c0_30] : memref<32x8x8xf32, #tpu.memory_space<vmem>>, vector<1x8x8xf32>
    %25 = vector.shape_cast %24 : vector<1x8x8xf32> to vector<8x8xf32>
    %c4_31 = arith.constant 4 : index
    %c0_32 = arith.constant 0 : index
    %c0_33 = arith.constant 0 : index
    %26 = vector.load %arg3[%c4_31, %c0_32, %c0_33] : memref<32x8x4xf32, #tpu.memory_space<vmem>>, vector<1x8x4xf32>
    %27 = vector.shape_cast %26 : vector<1x8x4xf32> to vector<8x4xf32>
    %cst_34 = arith.constant dense<0.000000e+00> : vector<8x4xf32>
    %28 = tpu.matmul %25, %27, %cst_34 {dimension_numbers = #tpu.dot_dimension_numbers<[1], [0], [0], [1], [0, 0, 1, 1], [], []>} : vector<8x8xf32>, vector<8x4xf32>, vector<8x4xf32> -> vector<8x4xf32>
    %c0_35 = arith.constant 0 : index
    %c16 = arith.constant 16 : index
    %29 = vector.load %arg4[%c0_35, %c16] : memref<8x128xf32, #tpu.memory_space<vmem>>, vector<8x4xf32>
    tpu.vector_store %arg4[%c0_35, %c16], %28 {strides = array<i32>} : memref<8x128xf32, #tpu.memory_space<vmem>>, vector<8x4xf32>,
    %c5 = arith.constant 5 : index
    %c0_36 = arith.constant 0 : index
    %c0_37 = arith.constant 0 : index
    %30 = vector.load %arg2[%c5, %c0_36, %c0_37] : memref<32x8x8xf32, #tpu.memory_space<vmem>>, vector<1x8x8xf32>
    %31 = vector.shape_cast %30 : vector<1x8x8xf32> to vector<8x8xf32>
    %c5_38 = arith.constant 5 : index
    %c0_39 = arith.constant 0 : index
    %c0_40 = arith.constant 0 : index
    %32 = vector.load %arg3[%c5_38, %c0_39, %c0_40] : memref<32x8x4xf32, #tpu.memory_space<vmem>>, vector<1x8x4xf32>
    %33 = vector.shape_cast %32 : vector<1x8x4xf32> to vector<8x4xf32>
    %cst_41 = arith.constant dense<0.000000e+00> : vector<8x4xf32>
    %34 = tpu.matmul %31, %33, %cst_41 {dimension_numbers = #tpu.dot_dimension_numbers<[1], [0], [0], [1], [0, 0, 1, 1], [], []>} : vector<8x8xf32>, vector<8x4xf32>, vector<8x4xf32> -> vector<8x4xf32>
    %c0_42 = arith.constant 0 : index
    %c20 = arith.constant 20 : index
    %35 = vector.load %arg4[%c0_42, %c20] : memref<8x128xf32, #tpu.memory_space<vmem>>, vector<8x4xf32>
    tpu.vector_store %arg4[%c0_42, %c20], %34 {strides = array<i32>} : memref<8x128xf32, #tpu.memory_space<vmem>>, vector<8x4xf32>,
    %c6 = arith.constant 6 : index
    %c0_43 = arith.constant 0 : index
    %c0_44 = arith.constant 0 : index
    %36 = vector.load %arg2[%c6, %c0_43, %c0_44] : memref<32x8x8xf32, #tpu.memory_space<vmem>>, vector<1x8x8xf32>
    %37 = vector.shape_cast %36 : vector<1x8x8xf32> to vector<8x8xf32>
    %c6_45 = arith.constant 6 : index
    %c0_46 = arith.constant 0 : index
    %c0_47 = arith.constant 0 : index
    %38 = vector.load %arg3[%c6_45, %c0_46, %c0_47] : memref<32x8x4xf32, #tpu.memory_space<vmem>>, vector<1x8x4xf32>
    %39 = vector.shape_cast %38 : vector<1x8x4xf32> to vector<8x4xf32>
    %cst_48 = arith.constant dense<0.000000e+00> : vector<8x4xf32>
    %40 = tpu.matmul %37, %39, %cst_48 {dimension_numbers = #tpu.dot_dimension_numbers<[1], [0], [0], [1], [0, 0, 1, 1], [], []>} : vector<8x8xf32>, vector<8x4xf32>, vector<8x4xf32> -> vector<8x4xf32>
    %c0_49 = arith.constant 0 : index
    %c24 = arith.constant 24 : index
    %41 = vector.load %arg4[%c0_49, %c24] : memref<8x128xf32, #tpu.memory_space<vmem>>, vector<8x4xf32>
    tpu.vector_store %arg4[%c0_49, %c24], %40 {strides = array<i32>} : memref<8x128xf32, #tpu.memory_space<vmem>>, vector<8x4xf32>,
    %c7 = arith.constant 7 : index
    %c0_50 = arith.constant 0 : index
    %c0_51 = arith.constant 0 : index
    %42 = vector.load %arg2[%c7, %c0_50, %c0_51] : memref<32x8x8xf32, #tpu.memory_space<vmem>>, vector<1x8x8xf32>
    %43 = vector.shape_cast %42 : vector<1x8x8xf32> to vector<8x8xf32>
    %c7_52 = arith.constant 7 : index
    %c0_53 = arith.constant 0 : index
    %c0_54 = arith.constant 0 : index
    %44 = vector.load %arg3[%c7_52, %c0_53, %c0_54] : memref<32x8x4xf32, #tpu.memory_space<vmem>>, vector<1x8x4xf32>
    %45 = vector.shape_cast %44 : vector<1x8x4xf32> to vector<8x4xf32>
    %cst_55 = arith.constant dense<0.000000e+00> : vector<8x4xf32>
    %46 = tpu.matmul %43, %45, %cst_55 {dimension_numbers = #tpu.dot_dimension_numbers<[1], [0], [0], [1], [0, 0, 1, 1], [], []>} : vector<8x8xf32>, vector<8x4xf32>, vector<8x4xf32> -> vector<8x4xf32>
    %c0_56 = arith.constant 0 : index
    %c28 = arith.constant 28 : index
    %47 = vector.load %arg4[%c0_56, %c28] : memref<8x128xf32, #tpu.memory_space<vmem>>, vector<8x4xf32>
    tpu.vector_store %arg4[%c0_56, %c28], %46 {strides = array<i32>} : memref<8x128xf32, #tpu.memory_space<vmem>>, vector<8x4xf32>,
    %c8_57 = arith.constant 8 : index
    %c0_58 = arith.constant 0 : index
    %c0_59 = arith.constant 0 : index
    %48 = vector.load %arg2[%c8_57, %c0_58, %c0_59] : memref<32x8x8xf32, #tpu.memory_space<vmem>>, vector<1x8x8xf32>
    %49 = vector.shape_cast %48 : vector<1x8x8xf32> to vector<8x8xf32>
    %c8_60 = arith.constant 8 : index
    %c0_61 = arith.constant 0 : index
    %c0_62 = arith.constant 0 : index
    %50 = vector.load %arg3[%c8_60, %c0_61, %c0_62] : memref<32x8x4xf32, #tpu.memory_space<vmem>>, vector<1x8x4xf32>
    %51 = vector.shape_cast %50 : vector<1x8x4xf32> to vector<8x4xf32>
    %cst_63 = arith.constant dense<0.000000e+00> : vector<8x4xf32>
    %52 = tpu.matmul %49, %51, %cst_63 {dimension_numbers = #tpu.dot_dimension_numbers<[1], [0], [0], [1], [0, 0, 1, 1], [], []>} : vector<8x8xf32>, vector<8x4xf32>, vector<8x4xf32> -> vector<8x4xf32>
    %c0_64 = arith.constant 0 : index
    %c32 = arith.constant 32 : index
    %53 = vector.load %arg4[%c0_64, %c32] : memref<8x128xf32, #tpu.memory_space<vmem>>, vector<8x4xf32>
    tpu.vector_store %arg4[%c0_64, %c32], %52 {strides = array<i32>} : memref<8x128xf32, #tpu.memory_space<vmem>>, vector<8x4xf32>,
    %c9 = arith.constant 9 : index
    %c0_65 = arith.constant 0 : index
    %c0_66 = arith.constant 0 : index
    %54 = vector.load %arg2[%c9, %c0_65, %c0_66] : memref<32x8x8xf32, #tpu.memory_space<vmem>>, vector<1x8x8xf32>
    %55 = vector.shape_cast %54 : vector<1x8x8xf32> to vector<8x8xf32>
    %c9_67 = arith.constant 9 : index
    %c0_68 = arith.constant 0 : index
    %c0_69 = arith.constant 0 : index
    %56 = vector.load %arg3[%c9_67, %c0_68, %c0_69] : memref<32x8x4xf32, #tpu.memory_space<vmem>>, vector<1x8x4xf32>
    %57 = vector.shape_cast %56 : vector<1x8x4xf32> to vector<8x4xf32>
    %cst_70 = arith.constant dense<0.000000e+00> : vector<8x4xf32>
    %58 = tpu.matmul %55, %57, %cst_70 {dimension_numbers = #tpu.dot_dimension_numbers<[1], [0], [0], [1], [0, 0, 1, 1], [], []>} : vector<8x8xf32>, vector<8x4xf32>, vector<8x4xf32> -> vector<8x4xf32>
    %c0_71 = arith.constant 0 : index
    %c36 = arith.constant 36 : index
    %59 = vector.load %arg4[%c0_71, %c36] : memref<8x128xf32, #tpu.memory_space<vmem>>, vector<8x4xf32>
    tpu.vector_store %arg4[%c0_71, %c36], %58 {strides = array<i32>} : memref<8x128xf32, #tpu.memory_space<vmem>>, vector<8x4xf32>,
    %c10 = arith.constant 10 : index
    %c0_72 = arith.constant 0 : index
    %c0_73 = arith.constant 0 : index
    %60 = vector.load %arg2[%c10, %c0_72, %c0_73] : memref<32x8x8xf32, #tpu.memory_space<vmem>>, vector<1x8x8xf32>
    %61 = vector.shape_cast %60 : vector<1x8x8xf32> to vector<8x8xf32>
    %c10_74 = arith.constant 10 : index
    %c0_75 = arith.constant 0 : index
    %c0_76 = arith.constant 0 : index
    %62 = vector.load %arg3[%c10_74, %c0_75, %c0_76] : memref<32x8x4xf32, #tpu.memory_space<vmem>>, vector<1x8x4xf32>
    %63 = vector.shape_cast %62 : vector<1x8x4xf32> to vector<8x4xf32>
    %cst_77 = arith.constant dense<0.000000e+00> : vector<8x4xf32>
    %64 = tpu.matmul %61, %63, %cst_77 {dimension_numbers = #tpu.dot_dimension_numbers<[1], [0], [0], [1], [0, 0, 1, 1], [], []>} : vector<8x8xf32>, vector<8x4xf32>, vector<8x4xf32> -> vector<8x4xf32>
    %c0_78 = arith.constant 0 : index
    %c40 = arith.constant 40 : index
    %65 = vector.load %arg4[%c0_78, %c40] : memref<8x128xf32, #tpu.memory_space<vmem>>, vector<8x4xf32>
    tpu.vector_store %arg4[%c0_78, %c40], %64 {strides = array<i32>} : memref<8x128xf32, #tpu.memory_space<vmem>>, vector<8x4xf32>,
    %c11 = arith.constant 11 : index
    %c0_79 = arith.constant 0 : index
    %c0_80 = arith.constant 0 : index
    %66 = vector.load %arg2[%c11, %c0_79, %c0_80] : memref<32x8x8xf32, #tpu.memory_space<vmem>>, vector<1x8x8xf32>
    %67 = vector.shape_cast %66 : vector<1x8x8xf32> to vector<8x8xf32>
    %c11_81 = arith.constant 11 : index
    %c0_82 = arith.constant 0 : index
    %c0_83 = arith.constant 0 : index
    %68 = vector.load %arg3[%c11_81, %c0_82, %c0_83] : memref<32x8x4xf32, #tpu.memory_space<vmem>>, vector<1x8x4xf32>
    %69 = vector.shape_cast %68 : vector<1x8x4xf32> to vector<8x4xf32>
    %cst_84 = arith.constant dense<0.000000e+00> : vector<8x4xf32>
    %70 = tpu.matmul %67, %69, %cst_84 {dimension_numbers = #tpu.dot_dimension_numbers<[1], [0], [0], [1], [0, 0, 1, 1], [], []>} : vector<8x8xf32>, vector<8x4xf32>, vector<8x4xf32> -> vector<8x4xf32>
    %c0_85 = arith.constant 0 : index
    %c44 = arith.constant 44 : index
    %71 = vector.load %arg4[%c0_85, %c44] : memref<8x128xf32, #tpu.memory_space<vmem>>, vector<8x4xf32>
    tpu.vector_store %arg4[%c0_85, %c44], %70 {strides = array<i32>} : memref<8x128xf32, #tpu.memory_space<vmem>>, vector<8x4xf32>,
    %c12_86 = arith.constant 12 : index
    %c0_87 = arith.constant 0 : index
    %c0_88 = arith.constant 0 : index
    %72 = vector.load %arg2[%c12_86, %c0_87, %c0_88] : memref<32x8x8xf32, #tpu.memory_space<vmem>>, vector<1x8x8xf32>
    %73 = vector.shape_cast %72 : vector<1x8x8xf32> to vector<8x8xf32>
    %c12_89 = arith.constant 12 : index
    %c0_90 = arith.constant 0 : index
    %c0_91 = arith.constant 0 : index
    %74 = vector.load %arg3[%c12_89, %c0_90, %c0_91] : memref<32x8x4xf32, #tpu.memory_space<vmem>>, vector<1x8x4xf32>
    %75 = vector.shape_cast %74 : vector<1x8x4xf32> to vector<8x4xf32>
    %cst_92 = arith.constant dense<0.000000e+00> : vector<8x4xf32>
    %76 = tpu.matmul %73, %75, %cst_92 {dimension_numbers = #tpu.dot_dimension_numbers<[1], [0], [0], [1], [0, 0, 1, 1], [], []>} : vector<8x8xf32>, vector<8x4xf32>, vector<8x4xf32> -> vector<8x4xf32>
    %c0_93 = arith.constant 0 : index
    %c48 = arith.constant 48 : index
    %77 = vector.load %arg4[%c0_93, %c48] : memref<8x128xf32, #tpu.memory_space<vmem>>, vector<8x4xf32>
    tpu.vector_store %arg4[%c0_93, %c48], %76 {strides = array<i32>} : memref<8x128xf32, #tpu.memory_space<vmem>>, vector<8x4xf32>,
    %c13 = arith.constant 13 : index
    %c0_94 = arith.constant 0 : index
    %c0_95 = arith.constant 0 : index
    %78 = vector.load %arg2[%c13, %c0_94, %c0_95] : memref<32x8x8xf32, #tpu.memory_space<vmem>>, vector<1x8x8xf32>
    %79 = vector.shape_cast %78 : vector<1x8x8xf32> to vector<8x8xf32>
    %c13_96 = arith.constant 13 : index
    %c0_97 = arith.constant 0 : index
    %c0_98 = arith.constant 0 : index
    %80 = vector.load %arg3[%c13_96, %c0_97, %c0_98] : memref<32x8x4xf32, #tpu.memory_space<vmem>>, vector<1x8x4xf32>
    %81 = vector.shape_cast %80 : vector<1x8x4xf32> to vector<8x4xf32>
    %cst_99 = arith.constant dense<0.000000e+00> : vector<8x4xf32>
    %82 = tpu.matmul %79, %81, %cst_99 {dimension_numbers = #tpu.dot_dimension_numbers<[1], [0], [0], [1], [0, 0, 1, 1], [], []>} : vector<8x8xf32>, vector<8x4xf32>, vector<8x4xf32> -> vector<8x4xf32>
    %c0_100 = arith.constant 0 : index
    %c52 = arith.constant 52 : index
    %83 = vector.load %arg4[%c0_100, %c52] : memref<8x128xf32, #tpu.memory_space<vmem>>, vector<8x4xf32>
    tpu.vector_store %arg4[%c0_100, %c52], %82 {strides = array<i32>} : memref<8x128xf32, #tpu.memory_space<vmem>>, vector<8x4xf32>,
    %c14 = arith.constant 14 : index
    %c0_101 = arith.constant 0 : index
    %c0_102 = arith.constant 0 : index
    %84 = vector.load %arg2[%c14, %c0_101, %c0_102] : memref<32x8x8xf32, #tpu.memory_space<vmem>>, vector<1x8x8xf32>
    %85 = vector.shape_cast %84 : vector<1x8x8xf32> to vector<8x8xf32>
    %c14_103 = arith.constant 14 : index
    %c0_104 = arith.constant 0 : index
    %c0_105 = arith.constant 0 : index
    %86 = vector.load %arg3[%c14_103, %c0_104, %c0_105] : memref<32x8x4xf32, #tpu.memory_space<vmem>>, vector<1x8x4xf32>
    %87 = vector.shape_cast %86 : vector<1x8x4xf32> to vector<8x4xf32>
    %cst_106 = arith.constant dense<0.000000e+00> : vector<8x4xf32>
    %88 = tpu.matmul %85, %87, %cst_106 {dimension_numbers = #tpu.dot_dimension_numbers<[1], [0], [0], [1], [0, 0, 1, 1], [], []>} : vector<8x8xf32>, vector<8x4xf32>, vector<8x4xf32> -> vector<8x4xf32>
    %c0_107 = arith.constant 0 : index
    %c56 = arith.constant 56 : index
    %89 = vector.load %arg4[%c0_107, %c56] : memref<8x128xf32, #tpu.memory_space<vmem>>, vector<8x4xf32>
    tpu.vector_store %arg4[%c0_107, %c56], %88 {strides = array<i32>} : memref<8x128xf32, #tpu.memory_space<vmem>>, vector<8x4xf32>,
    %c15 = arith.constant 15 : index
    %c0_108 = arith.constant 0 : index
    %c0_109 = arith.constant 0 : index
    %90 = vector.load %arg2[%c15, %c0_108, %c0_109] : memref<32x8x8xf32, #tpu.memory_space<vmem>>, vector<1x8x8xf32>
    %91 = vector.shape_cast %90 : vector<1x8x8xf32> to vector<8x8xf32>
    %c15_110 = arith.constant 15 : index
    %c0_111 = arith.constant 0 : index
    %c0_112 = arith.constant 0 : index
    %92 = vector.load %arg3[%c15_110, %c0_111, %c0_112] : memref<32x8x4xf32, #tpu.memory_space<vmem>>, vector<1x8x4xf32>
    %93 = vector.shape_cast %92 : vector<1x8x4xf32> to vector<8x4xf32>
    %cst_113 = arith.constant dense<0.000000e+00> : vector<8x4xf32>
    %94 = tpu.matmul %91, %93, %cst_113 {dimension_numbers = #tpu.dot_dimension_numbers<[1], [0], [0], [1], [0, 0, 1, 1], [], []>} : vector<8x8xf32>, vector<8x4xf32>, vector<8x4xf32> -> vector<8x4xf32>
    %c0_114 = arith.constant 0 : index
    %c60 = arith.constant 60 : index
    %95 = vector.load %arg4[%c0_114, %c60] : memref<8x128xf32, #tpu.memory_space<vmem>>, vector<8x4xf32>
    tpu.vector_store %arg4[%c0_114, %c60], %94 {strides = array<i32>} : memref<8x128xf32, #tpu.memory_space<vmem>>, vector<8x4xf32>,
    %c16_115 = arith.constant 16 : index
    %c0_116 = arith.constant 0 : index
    %c0_117 = arith.constant 0 : index
    %96 = vector.load %arg2[%c16_115, %c0_116, %c0_117] : memref<32x8x8xf32, #tpu.memory_space<vmem>>, vector<1x8x8xf32>
    %97 = vector.shape_cast %96 : vector<1x8x8xf32> to vector<8x8xf32>
    %c16_118 = arith.constant 16 : index
    %c0_119 = arith.constant 0 : index
    %c0_120 = arith.constant 0 : index
    %98 = vector.load %arg3[%c16_118, %c0_119, %c0_120] : memref<32x8x4xf32, #tpu.memory_space<vmem>>, vector<1x8x4xf32>
    %99 = vector.shape_cast %98 : vector<1x8x4xf32> to vector<8x4xf32>
    %cst_121 = arith.constant dense<0.000000e+00> : vector<8x4xf32>
    %100 = tpu.matmul %97, %99, %cst_121 {dimension_numbers = #tpu.dot_dimension_numbers<[1], [0], [0], [1], [0, 0, 1, 1], [], []>} : vector<8x8xf32>, vector<8x4xf32>, vector<8x4xf32> -> vector<8x4xf32>
    %c0_122 = arith.constant 0 : index
    %c64 = arith.constant 64 : index
    %101 = vector.load %arg4[%c0_122, %c64] : memref<8x128xf32, #tpu.memory_space<vmem>>, vector<8x4xf32>
    tpu.vector_store %arg4[%c0_122, %c64], %100 {strides = array<i32>} : memref<8x128xf32, #tpu.memory_space<vmem>>, vector<8x4xf32>,
    %c17 = arith.constant 17 : index
    %c0_123 = arith.constant 0 : index
    %c0_124 = arith.constant 0 : index
    %102 = vector.load %arg2[%c17, %c0_123, %c0_124] : memref<32x8x8xf32, #tpu.memory_space<vmem>>, vector<1x8x8xf32>
    %103 = vector.shape_cast %102 : vector<1x8x8xf32> to vector<8x8xf32>
    %c17_125 = arith.constant 17 : index
    %c0_126 = arith.constant 0 : index
    %c0_127 = arith.constant 0 : index
    %104 = vector.load %arg3[%c17_125, %c0_126, %c0_127] : memref<32x8x4xf32, #tpu.memory_space<vmem>>, vector<1x8x4xf32>
    %105 = vector.shape_cast %104 : vector<1x8x4xf32> to vector<8x4xf32>
    %cst_128 = arith.constant dense<0.000000e+00> : vector<8x4xf32>
    %106 = tpu.matmul %103, %105, %cst_128 {dimension_numbers = #tpu.dot_dimension_numbers<[1], [0], [0], [1], [0, 0, 1, 1], [], []>} : vector<8x8xf32>, vector<8x4xf32>, vector<8x4xf32> -> vector<8x4xf32>
    %c0_129 = arith.constant 0 : index
    %c68 = arith.constant 68 : index
    %107 = vector.load %arg4[%c0_129, %c68] : memref<8x128xf32, #tpu.memory_space<vmem>>, vector<8x4xf32>
    tpu.vector_store %arg4[%c0_129, %c68], %106 {strides = array<i32>} : memref<8x128xf32, #tpu.memory_space<vmem>>, vector<8x4xf32>,
    %c18 = arith.constant 18 : index
    %c0_130 = arith.constant 0 : index
    %c0_131 = arith.constant 0 : index
    %108 = vector.load %arg2[%c18, %c0_130, %c0_131] : memref<32x8x8xf32, #tpu.memory_space<vmem>>, vector<1x8x8xf32>
    %109 = vector.shape_cast %108 : vector<1x8x8xf32> to vector<8x8xf32>
    %c18_132 = arith.constant 18 : index
    %c0_133 = arith.constant 0 : index
    %c0_134 = arith.constant 0 : index
    %110 = vector.load %arg3[%c18_132, %c0_133, %c0_134] : memref<32x8x4xf32, #tpu.memory_space<vmem>>, vector<1x8x4xf32>
    %111 = vector.shape_cast %110 : vector<1x8x4xf32> to vector<8x4xf32>
    %cst_135 = arith.constant dense<0.000000e+00> : vector<8x4xf32>
    %112 = tpu.matmul %109, %111, %cst_135 {dimension_numbers = #tpu.dot_dimension_numbers<[1], [0], [0], [1], [0, 0, 1, 1], [], []>} : vector<8x8xf32>, vector<8x4xf32>, vector<8x4xf32> -> vector<8x4xf32>
    %c0_136 = arith.constant 0 : index
    %c72 = arith.constant 72 : index
    %113 = vector.load %arg4[%c0_136, %c72] : memref<8x128xf32, #tpu.memory_space<vmem>>, vector<8x4xf32>
    tpu.vector_store %arg4[%c0_136, %c72], %112 {strides = array<i32>} : memref<8x128xf32, #tpu.memory_space<vmem>>, vector<8x4xf32>,
    %c19 = arith.constant 19 : index
    %c0_137 = arith.constant 0 : index
    %c0_138 = arith.constant 0 : index
    %114 = vector.load %arg2[%c19, %c0_137, %c0_138] : memref<32x8x8xf32, #tpu.memory_space<vmem>>, vector<1x8x8xf32>
    %115 = vector.shape_cast %114 : vector<1x8x8xf32> to vector<8x8xf32>
    %c19_139 = arith.constant 19 : index
    %c0_140 = arith.constant 0 : index
    %c0_141 = arith.constant 0 : index
    %116 = vector.load %arg3[%c19_139, %c0_140, %c0_141] : memref<32x8x4xf32, #tpu.memory_space<vmem>>, vector<1x8x4xf32>
    %117 = vector.shape_cast %116 : vector<1x8x4xf32> to vector<8x4xf32>
    %cst_142 = arith.constant dense<0.000000e+00> : vector<8x4xf32>
    %118 = tpu.matmul %115, %117, %cst_142 {dimension_numbers = #tpu.dot_dimension_numbers<[1], [0], [0], [1], [0, 0, 1, 1], [], []>} : vector<8x8xf32>, vector<8x4xf32>, vector<8x4xf32> -> vector<8x4xf32>
    %c0_143 = arith.constant 0 : index
    %c76 = arith.constant 76 : index
    %119 = vector.load %arg4[%c0_143, %c76] : memref<8x128xf32, #tpu.memory_space<vmem>>, vector<8x4xf32>
    tpu.vector_store %arg4[%c0_143, %c76], %118 {strides = array<i32>} : memref<8x128xf32, #tpu.memory_space<vmem>>, vector<8x4xf32>,
    %c20_144 = arith.constant 20 : index
    %c0_145 = arith.constant 0 : index
    %c0_146 = arith.constant 0 : index
    %120 = vector.load %arg2[%c20_144, %c0_145, %c0_146] : memref<32x8x8xf32, #tpu.memory_space<vmem>>, vector<1x8x8xf32>
    %121 = vector.shape_cast %120 : vector<1x8x8xf32> to vector<8x8xf32>
    %c20_147 = arith.constant 20 : index
    %c0_148 = arith.constant 0 : index
    %c0_149 = arith.constant 0 : index
    %122 = vector.load %arg3[%c20_147, %c0_148, %c0_149] : memref<32x8x4xf32, #tpu.memory_space<vmem>>, vector<1x8x4xf32>
    %123 = vector.shape_cast %122 : vector<1x8x4xf32> to vector<8x4xf32>
    %cst_150 = arith.constant dense<0.000000e+00> : vector<8x4xf32>
    %124 = tpu.matmul %121, %123, %cst_150 {dimension_numbers = #tpu.dot_dimension_numbers<[1], [0], [0], [1], [0, 0, 1, 1], [], []>} : vector<8x8xf32>, vector<8x4xf32>, vector<8x4xf32> -> vector<8x4xf32>
    %c0_151 = arith.constant 0 : index
    %c80 = arith.constant 80 : index
    %125 = vector.load %arg4[%c0_151, %c80] : memref<8x128xf32, #tpu.memory_space<vmem>>, vector<8x4xf32>
    tpu.vector_store %arg4[%c0_151, %c80], %124 {strides = array<i32>} : memref<8x128xf32, #tpu.memory_space<vmem>>, vector<8x4xf32>,
    %c21 = arith.constant 21 : index
    %c0_152 = arith.constant 0 : index
    %c0_153 = arith.constant 0 : index
    %126 = vector.load %arg2[%c21, %c0_152, %c0_153] : memref<32x8x8xf32, #tpu.memory_space<vmem>>, vector<1x8x8xf32>
    %127 = vector.shape_cast %126 : vector<1x8x8xf32> to vector<8x8xf32>
    %c21_154 = arith.constant 21 : index
    %c0_155 = arith.constant 0 : index
    %c0_156 = arith.constant 0 : index
    %128 = vector.load %arg3[%c21_154, %c0_155, %c0_156] : memref<32x8x4xf32, #tpu.memory_space<vmem>>, vector<1x8x4xf32>
    %129 = vector.shape_cast %128 : vector<1x8x4xf32> to vector<8x4xf32>
    %cst_157 = arith.constant dense<0.000000e+00> : vector<8x4xf32>
    %130 = tpu.matmul %127, %129, %cst_157 {dimension_numbers = #tpu.dot_dimension_numbers<[1], [0], [0], [1], [0, 0, 1, 1], [], []>} : vector<8x8xf32>, vector<8x4xf32>, vector<8x4xf32> -> vector<8x4xf32>
    %c0_158 = arith.constant 0 : index
    %c84 = arith.constant 84 : index
    %131 = vector.load %arg4[%c0_158, %c84] : memref<8x128xf32, #tpu.memory_space<vmem>>, vector<8x4xf32>
    tpu.vector_store %arg4[%c0_158, %c84], %130 {strides = array<i32>} : memref<8x128xf32, #tpu.memory_space<vmem>>, vector<8x4xf32>,
    %c22 = arith.constant 22 : index
    %c0_159 = arith.constant 0 : index
    %c0_160 = arith.constant 0 : index
    %132 = vector.load %arg2[%c22, %c0_159, %c0_160] : memref<32x8x8xf32, #tpu.memory_space<vmem>>, vector<1x8x8xf32>
    %133 = vector.shape_cast %132 : vector<1x8x8xf32> to vector<8x8xf32>
    %c22_161 = arith.constant 22 : index
    %c0_162 = arith.constant 0 : index
    %c0_163 = arith.constant 0 : index
    %134 = vector.load %arg3[%c22_161, %c0_162, %c0_163] : memref<32x8x4xf32, #tpu.memory_space<vmem>>, vector<1x8x4xf32>
    %135 = vector.shape_cast %134 : vector<1x8x4xf32> to vector<8x4xf32>
    %cst_164 = arith.constant dense<0.000000e+00> : vector<8x4xf32>
    %136 = tpu.matmul %133, %135, %cst_164 {dimension_numbers = #tpu.dot_dimension_numbers<[1], [0], [0], [1], [0, 0, 1, 1], [], []>} : vector<8x8xf32>, vector<8x4xf32>, vector<8x4xf32> -> vector<8x4xf32>
    %c0_165 = arith.constant 0 : index
    %c88 = arith.constant 88 : index
    %137 = vector.load %arg4[%c0_165, %c88] : memref<8x128xf32, #tpu.memory_space<vmem>>, vector<8x4xf32>
    tpu.vector_store %arg4[%c0_165, %c88], %136 {strides = array<i32>} : memref<8x128xf32, #tpu.memory_space<vmem>>, vector<8x4xf32>,
    %c23 = arith.constant 23 : index
    %c0_166 = arith.constant 0 : index
    %c0_167 = arith.constant 0 : index
    %138 = vector.load %arg2[%c23, %c0_166, %c0_167] : memref<32x8x8xf32, #tpu.memory_space<vmem>>, vector<1x8x8xf32>
    %139 = vector.shape_cast %138 : vector<1x8x8xf32> to vector<8x8xf32>
    %c23_168 = arith.constant 23 : index
    %c0_169 = arith.constant 0 : index
    %c0_170 = arith.constant 0 : index
    %140 = vector.load %arg3[%c23_168, %c0_169, %c0_170] : memref<32x8x4xf32, #tpu.memory_space<vmem>>, vector<1x8x4xf32>
    %141 = vector.shape_cast %140 : vector<1x8x4xf32> to vector<8x4xf32>
    %cst_171 = arith.constant dense<0.000000e+00> : vector<8x4xf32>
    %142 = tpu.matmul %139, %141, %cst_171 {dimension_numbers = #tpu.dot_dimension_numbers<[1], [0], [0], [1], [0, 0, 1, 1], [], []>} : vector<8x8xf32>, vector<8x4xf32>, vector<8x4xf32> -> vector<8x4xf32>
    %c0_172 = arith.constant 0 : index
    %c92 = arith.constant 92 : index
    %143 = vector.load %arg4[%c0_172, %c92] : memref<8x128xf32, #tpu.memory_space<vmem>>, vector<8x4xf32>
    tpu.vector_store %arg4[%c0_172, %c92], %142 {strides = array<i32>} : memref<8x128xf32, #tpu.memory_space<vmem>>, vector<8x4xf32>,
    %c24_173 = arith.constant 24 : index
    %c0_174 = arith.constant 0 : index
    %c0_175 = arith.constant 0 : index
    %144 = vector.load %arg2[%c24_173, %c0_174, %c0_175] : memref<32x8x8xf32, #tpu.memory_space<vmem>>, vector<1x8x8xf32>
    %145 = vector.shape_cast %144 : vector<1x8x8xf32> to vector<8x8xf32>
    %c24_176 = arith.constant 24 : index
    %c0_177 = arith.constant 0 : index
    %c0_178 = arith.constant 0 : index
    %146 = vector.load %arg3[%c24_176, %c0_177, %c0_178] : memref<32x8x4xf32, #tpu.memory_space<vmem>>, vector<1x8x4xf32>
    %147 = vector.shape_cast %146 : vector<1x8x4xf32> to vector<8x4xf32>
    %cst_179 = arith.constant dense<0.000000e+00> : vector<8x4xf32>
    %148 = tpu.matmul %145, %147, %cst_179 {dimension_numbers = #tpu.dot_dimension_numbers<[1], [0], [0], [1], [0, 0, 1, 1], [], []>} : vector<8x8xf32>, vector<8x4xf32>, vector<8x4xf32> -> vector<8x4xf32>
    %c0_180 = arith.constant 0 : index
    %c96 = arith.constant 96 : index
    %149 = vector.load %arg4[%c0_180, %c96] : memref<8x128xf32, #tpu.memory_space<vmem>>, vector<8x4xf32>
    tpu.vector_store %arg4[%c0_180, %c96], %148 {strides = array<i32>} : memref<8x128xf32, #tpu.memory_space<vmem>>, vector<8x4xf32>,
    %c25 = arith.constant 25 : index
    %c0_181 = arith.constant 0 : index
    %c0_182 = arith.constant 0 : index
    %150 = vector.load %arg2[%c25, %c0_181, %c0_182] : memref<32x8x8xf32, #tpu.memory_space<vmem>>, vector<1x8x8xf32>
    %151 = vector.shape_cast %150 : vector<1x8x8xf32> to vector<8x8xf32>
    %c25_183 = arith.constant 25 : index
    %c0_184 = arith.constant 0 : index
    %c0_185 = arith.constant 0 : index
    %152 = vector.load %arg3[%c25_183, %c0_184, %c0_185] : memref<32x8x4xf32, #tpu.memory_space<vmem>>, vector<1x8x4xf32>
    %153 = vector.shape_cast %152 : vector<1x8x4xf32> to vector<8x4xf32>
    %cst_186 = arith.constant dense<0.000000e+00> : vector<8x4xf32>
    %154 = tpu.matmul %151, %153, %cst_186 {dimension_numbers = #tpu.dot_dimension_numbers<[1], [0], [0], [1], [0, 0, 1, 1], [], []>} : vector<8x8xf32>, vector<8x4xf32>, vector<8x4xf32> -> vector<8x4xf32>
    %c0_187 = arith.constant 0 : index
    %c100 = arith.constant 100 : index
    %155 = vector.load %arg4[%c0_187, %c100] : memref<8x128xf32, #tpu.memory_space<vmem>>, vector<8x4xf32>
    tpu.vector_store %arg4[%c0_187, %c100], %154 {strides = array<i32>} : memref<8x128xf32, #tpu.memory_space<vmem>>, vector<8x4xf32>,
    %c26 = arith.constant 26 : index
    %c0_188 = arith.constant 0 : index
    %c0_189 = arith.constant 0 : index
    %156 = vector.load %arg2[%c26, %c0_188, %c0_189] : memref<32x8x8xf32, #tpu.memory_space<vmem>>, vector<1x8x8xf32>
    %157 = vector.shape_cast %156 : vector<1x8x8xf32> to vector<8x8xf32>
    %c26_190 = arith.constant 26 : index
    %c0_191 = arith.constant 0 : index
    %c0_192 = arith.constant 0 : index
    %158 = vector.load %arg3[%c26_190, %c0_191, %c0_192] : memref<32x8x4xf32, #tpu.memory_space<vmem>>, vector<1x8x4xf32>
    %159 = vector.shape_cast %158 : vector<1x8x4xf32> to vector<8x4xf32>
    %cst_193 = arith.constant dense<0.000000e+00> : vector<8x4xf32>
    %160 = tpu.matmul %157, %159, %cst_193 {dimension_numbers = #tpu.dot_dimension_numbers<[1], [0], [0], [1], [0, 0, 1, 1], [], []>} : vector<8x8xf32>, vector<8x4xf32>, vector<8x4xf32> -> vector<8x4xf32>
    %c0_194 = arith.constant 0 : index
    %c104 = arith.constant 104 : index
    %161 = vector.load %arg4[%c0_194, %c104] : memref<8x128xf32, #tpu.memory_space<vmem>>, vector<8x4xf32>
    tpu.vector_store %arg4[%c0_194, %c104], %160 {strides = array<i32>} : memref<8x128xf32, #tpu.memory_space<vmem>>, vector<8x4xf32>,
    %c27 = arith.constant 27 : index
    %c0_195 = arith.constant 0 : index
    %c0_196 = arith.constant 0 : index
    %162 = vector.load %arg2[%c27, %c0_195, %c0_196] : memref<32x8x8xf32, #tpu.memory_space<vmem>>, vector<1x8x8xf32>
    %163 = vector.shape_cast %162 : vector<1x8x8xf32> to vector<8x8xf32>
    %c27_197 = arith.constant 27 : index
    %c0_198 = arith.constant 0 : index
    %c0_199 = arith.constant 0 : index
    %164 = vector.load %arg3[%c27_197, %c0_198, %c0_199] : memref<32x8x4xf32, #tpu.memory_space<vmem>>, vector<1x8x4xf32>
    %165 = vector.shape_cast %164 : vector<1x8x4xf32> to vector<8x4xf32>
    %cst_200 = arith.constant dense<0.000000e+00> : vector<8x4xf32>
    %166 = tpu.matmul %163, %165, %cst_200 {dimension_numbers = #tpu.dot_dimension_numbers<[1], [0], [0], [1], [0, 0, 1, 1], [], []>} : vector<8x8xf32>, vector<8x4xf32>, vector<8x4xf32> -> vector<8x4xf32>
    %c0_201 = arith.constant 0 : index
    %c108 = arith.constant 108 : index
    %167 = vector.load %arg4[%c0_201, %c108] : memref<8x128xf32, #tpu.memory_space<vmem>>, vector<8x4xf32>
    tpu.vector_store %arg4[%c0_201, %c108], %166 {strides = array<i32>} : memref<8x128xf32, #tpu.memory_space<vmem>>, vector<8x4xf32>,
    %c28_202 = arith.constant 28 : index
    %c0_203 = arith.constant 0 : index
    %c0_204 = arith.constant 0 : index
    %168 = vector.load %arg2[%c28_202, %c0_203, %c0_204] : memref<32x8x8xf32, #tpu.memory_space<vmem>>, vector<1x8x8xf32>
    %169 = vector.shape_cast %168 : vector<1x8x8xf32> to vector<8x8xf32>
    %c28_205 = arith.constant 28 : index
    %c0_206 = arith.constant 0 : index
    %c0_207 = arith.constant 0 : index
    %170 = vector.load %arg3[%c28_205, %c0_206, %c0_207] : memref<32x8x4xf32, #tpu.memory_space<vmem>>, vector<1x8x4xf32>
    %171 = vector.shape_cast %170 : vector<1x8x4xf32> to vector<8x4xf32>
    %cst_208 = arith.constant dense<0.000000e+00> : vector<8x4xf32>
    %172 = tpu.matmul %169, %171, %cst_208 {dimension_numbers = #tpu.dot_dimension_numbers<[1], [0], [0], [1], [0, 0, 1, 1], [], []>} : vector<8x8xf32>, vector<8x4xf32>, vector<8x4xf32> -> vector<8x4xf32>
    %c0_209 = arith.constant 0 : index
    %c112 = arith.constant 112 : index
    %173 = vector.load %arg4[%c0_209, %c112] : memref<8x128xf32, #tpu.memory_space<vmem>>, vector<8x4xf32>
    tpu.vector_store %arg4[%c0_209, %c112], %172 {strides = array<i32>} : memref<8x128xf32, #tpu.memory_space<vmem>>, vector<8x4xf32>,
    %c29 = arith.constant 29 : index
    %c0_210 = arith.constant 0 : index
    %c0_211 = arith.constant 0 : index
    %174 = vector.load %arg2[%c29, %c0_210, %c0_211] : memref<32x8x8xf32, #tpu.memory_space<vmem>>, vector<1x8x8xf32>
    %175 = vector.shape_cast %174 : vector<1x8x8xf32> to vector<8x8xf32>
    %c29_212 = arith.constant 29 : index
    %c0_213 = arith.constant 0 : index
    %c0_214 = arith.constant 0 : index
    %176 = vector.load %arg3[%c29_212, %c0_213, %c0_214] : memref<32x8x4xf32, #tpu.memory_space<vmem>>, vector<1x8x4xf32>
    %177 = vector.shape_cast %176 : vector<1x8x4xf32> to vector<8x4xf32>
    %cst_215 = arith.constant dense<0.000000e+00> : vector<8x4xf32>
    %178 = tpu.matmul %175, %177, %cst_215 {dimension_numbers = #tpu.dot_dimension_numbers<[1], [0], [0], [1], [0, 0, 1, 1], [], []>} : vector<8x8xf32>, vector<8x4xf32>, vector<8x4xf32> -> vector<8x4xf32>
    %c0_216 = arith.constant 0 : index
    %c116 = arith.constant 116 : index
    %179 = vector.load %arg4[%c0_216, %c116] : memref<8x128xf32, #tpu.memory_space<vmem>>, vector<8x4xf32>
    tpu.vector_store %arg4[%c0_216, %c116], %178 {strides = array<i32>} : memref<8x128xf32, #tpu.memory_space<vmem>>, vector<8x4xf32>,
    %c30 = arith.constant 30 : index
    %c0_217 = arith.constant 0 : index
    %c0_218 = arith.constant 0 : index
    %180 = vector.load %arg2[%c30, %c0_217, %c0_218] : memref<32x8x8xf32, #tpu.memory_space<vmem>>, vector<1x8x8xf32>
    %181 = vector.shape_cast %180 : vector<1x8x8xf32> to vector<8x8xf32>
    %c30_219 = arith.constant 30 : index
    %c0_220 = arith.constant 0 : index
    %c0_221 = arith.constant 0 : index
    %182 = vector.load %arg3[%c30_219, %c0_220, %c0_221] : memref<32x8x4xf32, #tpu.memory_space<vmem>>, vector<1x8x4xf32>
    %183 = vector.shape_cast %182 : vector<1x8x4xf32> to vector<8x4xf32>
    %cst_222 = arith.constant dense<0.000000e+00> : vector<8x4xf32>
    %184 = tpu.matmul %181, %183, %cst_222 {dimension_numbers = #tpu.dot_dimension_numbers<[1], [0], [0], [1], [0, 0, 1, 1], [], []>} : vector<8x8xf32>, vector<8x4xf32>, vector<8x4xf32> -> vector<8x4xf32>
    %c0_223 = arith.constant 0 : index
    %c120 = arith.constant 120 : index
    %185 = vector.load %arg4[%c0_223, %c120] : memref<8x128xf32, #tpu.memory_space<vmem>>, vector<8x4xf32>
    tpu.vector_store %arg4[%c0_223, %c120], %184 {strides = array<i32>} : memref<8x128xf32, #tpu.memory_space<vmem>>, vector<8x4xf32>,
    %c31 = arith.constant 31 : index
    %c0_224 = arith.constant 0 : index
    %c0_225 = arith.constant 0 : index
    %186 = vector.load %arg2[%c31, %c0_224, %c0_225] : memref<32x8x8xf32, #tpu.memory_space<vmem>>, vector<1x8x8xf32>
    %187 = vector.shape_cast %186 : vector<1x8x8xf32> to vector<8x8xf32>
    %c31_226 = arith.constant 31 : index
    %c0_227 = arith.constant 0 : index
    %c0_228 = arith.constant 0 : index
    %188 = vector.load %arg3[%c31_226, %c0_227, %c0_228] : memref<32x8x4xf32, #tpu.memory_space<vmem>>, vector<1x8x4xf32>
    %189 = vector.shape_cast %188 : vector<1x8x4xf32> to vector<8x4xf32>
    %cst_229 = arith.constant dense<0.000000e+00> : vector<8x4xf32>
    %190 = tpu.matmul %187, %189, %cst_229 {dimension_numbers = #tpu.dot_dimension_numbers<[1], [0], [0], [1], [0, 0, 1, 1], [], []>} : vector<8x8xf32>, vector<8x4xf32>, vector<8x4xf32> -> vector<8x4xf32>
    %c0_230 = arith.constant 0 : index
    %c124 = arith.constant 124 : index
    %191 = vector.load %arg4[%c0_230, %c124] : memref<8x128xf32, #tpu.memory_space<vmem>>, vector<8x4xf32>
    tpu.vector_store %arg4[%c0_230, %c124], %190 {strides = array<i32>} : memref<8x128xf32, #tpu.memory_space<vmem>>, vector<8x4xf32>,
    return
  }
  func.func @transform_0(%arg0: i32, %arg1: i32) -> (i32, i32, i32) {
    %c0_i32 = arith.constant 0 : i32
    %c0_i32_0 = arith.constant 0 : i32
    return %arg1, %arg0, %c0_i32 : i32, i32, i32
  }
  func.func @transform_1(%arg0: i32, %arg1: i32) -> (i32, i32, i32) {
    %c0_i32 = arith.constant 0 : i32
    %c0_i32_0 = arith.constant 0 : i32
    %c0_i32_1 = arith.constant 0 : i32
    return %arg1, %c0_i32, %c0_i32_0 : i32, i32, i32
  }
  func.func @transform_2(%arg0: i32, %arg1: i32) -> (i32, i32) {
    %c0_i32 = arith.constant 0 : i32
    return %arg0, %arg1 : i32, i32
  }
}

</mosaic_0001>

<bundles_post_ra>
// kernel: tpu_custom_call.1
= control target key start
LH: loop header
LB: loop body
LE: loop exit
PB: predicated region body
PF: predicated region fallthrough
CT: control target
= control target key end

     0   :  { %7 = vsyncpa [#allocation3], 0  ;;  %s3291_s0 = inlined_call_operand.hbm [shape: f32[32,8,8], index: 0, kind: input, shape index: {}]   ;;  %s3292_s1 = inlined_call_operand.hbm [shape: f32[32,8,4], index: 1, kind: input, shape index: {}]   ;;  %s3293_s2 = inlined_call_operand.hbm [shape: f32[8,128], index: 2, kind: output, shape index: {}]  }
   0x1   :  { %8 = vsyncpa [#allocation6], 0 }
   0x2   :  { %9 = vsyncpa [#allocation4], 0  ;;  %s3072_s9 = smov [#allocation2]   ;;  %s3000_s13 = scalar_lea.hbm %s3291_s0, 4096 }
   0x3   :  { %s15_s10 = sshll.u32 %s3072_s9, 4  ;;  %p3001_p0 = scmp.ne.s32.totalorder %s3291_s0, %s3000_s13  ;;  %s16_s10 = int_to_ptr.vmem [resolvable:$true] %s15_s10 }
   0x4   :  { %p3004_p1 = scmp.lt.u32.totalorder %s3000_s13, %s3291_s0 }
   0x6   :  { %p3006_p2 = pnand %p3004_p1, %p3001_p0 }
   0x8   :  { %3009 = shalt.err (!%p3006_p2)
}
   0x9   :  { %s3010_s18 = scalar_lea.vmem %s16_s10, 4096  ;;  %p3015_p4 = scmp.lt.s32.totalorder %s16_s10, %s16_s10 }
   0xa   :  { %p3011_p3 = scmp.ne.s32.totalorder %s16_s10, %s3010_s18  ;;  %p3016_p5 = scmp.lt.s32.totalorder %s3010_s18, %s3010_s18 }
   0xc   :  { %p3017_p6 = por %p3016_p5, %p3015_p4 }
   0xe   :  { %p3018_p7 = pnand %p3017_p6, %p3011_p3 }
  0x10   :  { %3021 = shalt.err (!%p3018_p7)
}
  0x11   :  { %s3073_s19 = smov 128   ;;  %s3074_s20 = smov 8  }
  0x12   :  { %21 = dma.hbm_to_vmem [thread:$0]  %s3291_s0, 4096, %s16_s10, [#allocation3], %s3073_s19, %s3073_s19, %s3074_s20  }
  0x13   :  { %s3075_s23 = smov [#allocation5]   ;;  %s3022_s27 = scalar_lea.hbm %s3292_s1, 4096 }
  0x14   :  { %s27_s24 = sshll.u32 %s3075_s23, 4  ;;  %p3023_p8 = scmp.ne.s32.totalorder %s3292_s1, %s3022_s27  ;;  %s28_s24 = int_to_ptr.vmem [resolvable:$true] %s27_s24 }
  0x15   :  { %p3026_p9 = scmp.lt.u32.totalorder %s3022_s27, %s3292_s1 }
  0x17   :  { %p3028_p10 = pnand %p3026_p9, %p3023_p8 }
  0x19   :  { %3031 = shalt.err (!%p3028_p10)
}
  0x1a   :  { %s3032_s4 = scalar_lea.vmem %s28_s24, 4096  ;;  %p3037_p12 = scmp.lt.s32.totalorder %s28_s24, %s28_s24 }
  0x1b   :  { %p3033_p11 = scmp.ne.s32.totalorder %s28_s24, %s3032_s4  ;;  %p3038_p13 = scmp.lt.s32.totalorder %s3032_s4, %s3032_s4 }
  0x1d   :  { %p3039_p0 = por %p3038_p13, %p3037_p12 }
  0x1f   :  { %p3040_p1 = pnand %p3039_p0, %p3033_p11 }
  0x21   :  { %3043 = shalt.err (!%p3040_p1)
}
  0x22   :  { %33 = dma.hbm_to_vmem [thread:$0]  %s3292_s1, 4096, %s28_s24, [#allocation6], %s3073_s19, %s3073_s19, %s3074_s20  }
  0x23   :  { %3066 = dma.done.wait [#allocation3], 4096  }
  0x24   :  { %3067 = vsyncadd [#allocation3], 4294963200 }
  0x25   :  { %3068 = dma.done.wait [#allocation6], 4096  }
  0x26   :  { %3069 = vsyncadd [#allocation6], 4294963200  ;;  %v3076_v0 = vmov 0.0   ;;  %vm3077_vm0 = vmmov 0   ;;  %vm42_vm1 = vcmask 64512   ;;  %v41_v1 = vld [vmem:[#allocation5] sm:$0xff] }
  0x27   :  { %2803 = vmatprep.subr.mxu0 %v3076_v0  ;;  %2808 = vmatprep.subr.mxu1 %v3076_v0  ;;  %v121_v2 = vld [vmem:[#allocation5 + $0x8] sm:$0xff]  ;;  %v40_v3 = vld [vmem:[#allocation2] sm:$0xff]  ;;  %v204_v5 = vld [vmem:[#allocation5 + $0x10] sm:$0xff]  ;;  %vm116_vm2 = vcmask 31744   ;;  %s3078_s1 = smov 4   ;;  %s3079_s6 = smov 12  }
  0x28   :  { %2805 = vmatprep.mubr.msk.f32.mxu0 %vm3077_vm0, %v3076_v0  ;;  %2810 = vmatprep.mubr.msk.f32.mxu1 %vm3077_vm0, %v3076_v0  ;;  %v119_v4 = vld [vmem:[#allocation2 + $0x8] sm:$0xff]  ;;  %v287_v6 = vld [vmem:[#allocation5 + $0x18] sm:$0xff]  ;;  %v202_v7 = vld [vmem:[#allocation2 + $0x10] sm:$0xff]  ;;  %s3080_s7 = smov 16   ;;  %s3081_s8 = smov 20   ;;  %vm199_vm3 = vcmask 64544  }
  0x29   :  { %2804 = vmatpush3.msra.mxu0 %v41_v1  ;;  %2809 = vmatpush3.msra.mxu1 %v121_v2  ;;  %v285_v8 = vld [vmem:[#allocation2 + $0x18] sm:$0xff]  ;;  %v370_v9 = vld [vmem:[#allocation5 + $0x20] sm:$0xff]  ;;  %v453_v10 = vld [vmem:[#allocation5 + $0x28] sm:$0xff]  ;;  %s3082_s9 = smov 24   ;;  %s3083_s10 = smov 28   ;;  %vm282_vm4 = vcmask 97344  }
  0x2a   :  { %2806 = vmatmul.mubr.msk.f32.vlgmr.msra.gmra.mrb[0].mxu0 %vm42_vm1, %v40_v3  ;;  %2811 = vmatmul.mubr.msk.f32.vlgmr.msra.gmra.mrb[0].mxu1 %vm42_vm1, %v119_v4  ;;  %v368_v11 = vld [vmem:[#allocation2 + $0x20] sm:$0xff]  ;;  %v451_v12 = vld [vmem:[#allocation2 + $0x28] sm:$0xff]  ;;  %v536_v13 = vld [vmem:[#allocation5 + $0x30] sm:$0xff]  ;;  %s3084_s11 = smov 32   ;;  %s3085_s12 = smov 36   ;;  %vm365_vm5 = vcmask 130144  }
  0x2b   :  { %2813 = vmatprep.subr.mxu0 %v3076_v0  ;;  %2818 = vmatprep.subr.mxu1 %v3076_v0  ;;  %v619_v14 = vld [vmem:[#allocation5 + $0x38] sm:$0xff]  ;;  %v534_v15 = vld [vmem:[#allocation2 + $0x30] sm:$0xff]  ;;  %v702_v17 = vld [vmem:[#allocation5 + $0x40] sm:$0xff]  ;;  %s3086_s13 = smov 40   ;;  %s3087_s14 = smov 44   ;;  %vm448_vm6 = vcmask 162944  }
  0x2c   :  { %2814 = vmatpush3.msra.mxu0 %v204_v5  ;;  %2819 = vmatpush3.msra.mxu1 %v287_v6  ;;  %v617_v16 = vld [vmem:[#allocation2 + $0x38] sm:$0xff]  ;;  %v785_v18 = vld [vmem:[#allocation5 + $0x48] sm:$0xff]  ;;  %v700_v19 = vld [vmem:[#allocation2 + $0x40] sm:$0xff]  ;;  %s3088_s15 = smov 48   ;;  %s3089_s16 = smov 52   ;;  %vm531_vm7 = vcmask 195744  }
  0x2d   :  { %2815 = vmatprep.mubr.msk.f32.mxu0 %vm3077_vm0, %v3076_v0  ;;  %2820 = vmatprep.mubr.msk.f32.mxu1 %vm3077_vm0, %v3076_v0  ;;  %v783_v20 = vld [vmem:[#allocation2 + $0x48] sm:$0xff]  ;;  %v868_v21 = vld [vmem:[#allocation5 + $0x50] sm:$0xff]  ;;  %v951_v22 = vld [vmem:[#allocation5 + $0x58] sm:$0xff]  ;;  %s3090_s17 = smov 56   ;;  %s3091_s18 = smov 60   ;;  %vm614_vm8 = vcmask 228544  }
  0x2e   :  { %2816 = vmatmul.mubr.msk.f32.vlgmr.msra.gmra.mrb[2].mxu0 %vm42_vm1, %v202_v7  ;;  %2821 = vmatmul.mubr.msk.f32.vlgmr.msra.gmra.mrb[2].mxu1 %vm42_vm1, %v285_v8  ;;  %v866_v23 = vld [vmem:[#allocation2 + $0x50] sm:$0xff]  ;;  %v949_v24 = vld [vmem:[#allocation2 + $0x58] sm:$0xff]  ;;  %v1034_v25 = vld [vmem:[#allocation5 + $0x60] sm:$0xff]  ;;  %s3092_s19 = smov 64   ;;  %s3094_s21 = smov 72   ;;  %vm697_vm9 = vcmask 261344  }
  0x2f   :  { %2823 = vmatprep.subr.mxu0 %v3076_v0  ;;  %2828 = vmatprep.subr.mxu1 %v3076_v0  ;;  %v1117_v26 = vld [vmem:[#allocation5 + $0x68] sm:$0xff]  ;;  %v1032_v27 = vld [vmem:[#allocation2 + $0x60] sm:$0xff]  ;;  %v1200_v29 = vld [vmem:[#allocation5 + $0x70] sm:$0xff]  ;;  %s3095_s22 = smov 76   ;;  %s3096_s23 = smov 80   ;;  %vm780_vm10 = vcmask 294144  }
  0x30   :  { %2824 = vmatpush3.msra.mxu0 %v370_v9  ;;  %2829 = vmatpush3.msra.mxu1 %v453_v10  ;;  %v1115_v28 = vld [vmem:[#allocation2 + $0x68] sm:$0xff]  ;;  %v1283_v30 = vld [vmem:[#allocation5 + $0x78] sm:$0xff]  ;;  %v1198_v31 = vld [vmem:[#allocation2 + $0x70] sm:$0xff]  ;;  %s3097_s24 = smov 84   ;;  %s3098_s25 = smov 88   ;;  %vm863_vm11 = vcmask 326944  }
  0x31   :  { %2825 = vmatprep.mubr.msk.f32.mxu0 %vm3077_vm0, %v3076_v0  ;;  %2830 = vmatprep.mubr.msk.f32.mxu1 %vm3077_vm0, %v3076_v0  ;;  %v1281_v32 = vld [vmem:[#allocation2 + $0x78] sm:$0xff]  ;;  %v1366_v33 = vld [vmem:[#allocation5 + $0x80] sm:$0xff]  ;;  %v1449_v34 = vld [vmem:[#allocation5 + $0x88] sm:$0xff]  ;;  %s3099_s26 = smov 92   ;;  %s3100_s27 = smov 96   ;;  %vm946_vm12 = vcmask 359744  }
  0x32   :  { %2826 = vmatmul.mubr.msk.f32.vlgmr.msra.gmra.mrb[4].mxu0 %vm42_vm1, %v368_v11  ;;  %2833 = vmatprep.subr.mxu0 %v3076_v0  ;;  %v1364_v35 = vld [vmem:[#allocation2 + $0x80] sm:$0xff]  ;;  %v1447_v36 = vld [vmem:[#allocation2 + $0x88] sm:$0xff]  ;;  %v1532_v37 = vld [vmem:[#allocation5 + $0x90] sm:$0xff]  ;;  %s3101_s28 = smov 100   ;;  %s3102_s29 = smov 104   ;;  %vm1029_vm13 = vcmask 392544  }
  0x33   :  { %2831 = vmatmul.mubr.msk.f32.vlgmr.msra.gmra.mrb[4].mxu1 %vm42_vm1, %v451_v12  ;;  %2834 = vmatpush3.msra.mxu0 %v536_v13  ;;  %v1615_v38 = vld [vmem:[#allocation5 + $0x98] sm:$0xff]  ;;  %v1530_v39 = vld [vmem:[#allocation2 + $0x90] sm:$0xff]  ;;  %v1698_v41 = vld [vmem:[#allocation5 + $0xa0] sm:$0xff]  ;;  %s3103_s30 = smov 108   ;;  %s3104_s3 = smov 112   ;;  %vm1112_vm14 = vcmask 425344  }
  0x34   :  { %2838 = vmatprep.subr.mxu1 %v3076_v0  ;;  %2835 = vmatprep.mubr.msk.f32.mxu0 %vm3077_vm0, %v3076_v0  ;;  %v1613_v40 = vld [vmem:[#allocation2 + $0x98] sm:$0xff]  ;;  %v1781_v42 = vld [vmem:[#allocation5 + $0xa8] sm:$0xff]  ;;  %v1696_v43 = vld [vmem:[#allocation2 + $0xa0] sm:$0xff]  ;;  %s3105_s4 = smov 116   ;;  %s3106_s0 = smov 120   ;;  %vm1195_vm15 = vcmask 458144  }
  0x35   :  { %2839 = vmatpush3.msra.mxu1 %v619_v14  ;;  %2840 = vmatprep.mubr.msk.f32.mxu1 %vm3077_vm0, %v3076_v0  ;;  %v1779_v44 = vld [vmem:[#allocation2 + $0xa8] sm:$0xff]  ;;  %v1864_v45 = vld [vmem:[#allocation5 + $0xb0] sm:$0xff]  ;;  %v1947_v46 = vld [vmem:[#allocation5 + $0xb8] sm:$0xff]  ;;  %s3107_s5 = smov 124  }
  0x36   :  { %2836 = vmatmul.mubr.msk.f32.vlgmr.msra.gmra.mrb[6].mxu0 %vm42_vm1, %v534_v15  ;;  %2843 = vmatprep.subr.mxu0 %v3076_v0  ;;  %v1862_v47 = vld [vmem:[#allocation2 + $0xb0] sm:$0xff]  ;;  %v1945_v48 = vld [vmem:[#allocation2 + $0xb8] sm:$0xff]  ;;  %v2030_v49 = vld [vmem:[#allocation5 + $0xc0] sm:$0xff] }
  0x37   :  { %2841 = vmatmul.mubr.msk.f32.vlgmr.msra.gmra.mrb[6].mxu1 %vm42_vm1, %v617_v16  ;;  %2844 = vmatpush3.msra.mxu0 %v702_v17  ;;  %v2113_v50 = vld [vmem:[#allocation5 + $0xc8] sm:$0xff]  ;;  %v2028_v51 = vld [vmem:[#allocation2 + $0xc0] sm:$0xff]  ;;  %v2196_v53 = vld [vmem:[#allocation5 + $0xd0] sm:$0xff] }
  0x38   :  { %2848 = vmatprep.subr.mxu1 %v3076_v0  ;;  %2845 = vmatprep.mubr.msk.f32.mxu0 %vm3077_vm0, %v3076_v0  ;;  %v2111_v52 = vld [vmem:[#allocation2 + $0xc8] sm:$0xff]  ;;  %v2279_v54 = vld [vmem:[#allocation5 + $0xd8] sm:$0xff]  ;;  %v2194_v55 = vld [vmem:[#allocation2 + $0xd0] sm:$0xff] }
  0x39   :  { %2849 = vmatpush3.msra.mxu1 %v785_v18  ;;  %2850 = vmatprep.mubr.msk.f32.mxu1 %vm3077_vm0, %v3076_v0  ;;  %v2277_v56 = vld [vmem:[#allocation2 + $0xd8] sm:$0xff]  ;;  %v2362_v57 = vld [vmem:[#allocation5 + $0xe0] sm:$0xff]  ;;  %v2445_v58 = vld [vmem:[#allocation5 + $0xe8] sm:$0xff] }
  0x3a   :  { %2846 = vmatmul.mubr.msk.f32.vlgmr.msra.gmra.mrb[8].mxu0 %vm42_vm1, %v700_v19  ;;  %2853 = vmatprep.subr.mxu0 %v3076_v0  ;;  %v2360_v59 = vld [vmem:[#allocation2 + $0xe0] sm:$0xff]  ;;  %v2443_v60 = vld [vmem:[#allocation2 + $0xe8] sm:$0xff]  ;;  %v2528_v61 = vld [vmem:[#allocation5 + $0xf0] sm:$0xff] }
  0x3b   :  { %2851 = vmatmul.mubr.msk.f32.vlgmr.msra.gmra.mrb[8].mxu1 %vm42_vm1, %v783_v20  ;;  %2854 = vmatpush3.msra.mxu0 %v868_v21  ;;  %v2611_v62 = vld [vmem:[#allocation5 + $0xf8] sm:$0xff]  ;;  %v2526_v63 = vld [vmem:[#allocation2 + $0xf0] sm:$0xff] }
  0x3c   :  { %2858 = vmatprep.subr.mxu1 %v3076_v0  ;;  %2855 = vmatprep.mubr.msk.f32.mxu0 %vm3077_vm0, %v3076_v0  ;;  %v2609_v1 = vld [vmem:[#allocation2 + $0xf8] sm:$0xff] }
  0x3d   :  { %2859 = vmatpush3.msra.mxu1 %v951_v22  ;;  %2860 = vmatprep.mubr.msk.f32.mxu1 %vm3077_vm0, %v3076_v0 }
  0x3e   :  { %2856 = vmatmul.mubr.msk.f32.vlgmr.msra.gmra.mrb[10].mxu0 %vm42_vm1, %v866_v23  ;;  %2863 = vmatprep.subr.mxu0 %v3076_v0 }
  0x3f   :  { %2861 = vmatmul.mubr.msk.f32.vlgmr.msra.gmra.mrb[10].mxu1 %vm42_vm1, %v949_v24  ;;  %2864 = vmatpush3.msra.mxu0 %v1034_v25 }
  0x40   :  { %2868 = vmatprep.subr.mxu1 %v3076_v0  ;;  %2865 = vmatprep.mubr.msk.f32.mxu0 %vm3077_vm0, %v3076_v0 }
  0x41   :  { %2869 = vmatpush3.msra.mxu1 %v1117_v26  ;;  %2870 = vmatprep.mubr.msk.f32.mxu1 %vm3077_vm0, %v3076_v0 }
  0x42   :  { %2866 = vmatmul.mubr.msk.f32.vlgmr.msra.gmra.mrb[12].mxu0 %vm42_vm1, %v1032_v27  ;;  %2873 = vmatprep.subr.mxu0 %v3076_v0 }
  0x43   :  { %2871 = vmatmul.mubr.msk.f32.vlgmr.msra.gmra.mrb[12].mxu1 %vm42_vm1, %v1115_v28  ;;  %2874 = vmatpush3.msra.mxu0 %v1200_v29 }
  0x44   :  { %2878 = vmatprep.subr.mxu1 %v3076_v0  ;;  %2875 = vmatprep.mubr.msk.f32.mxu0 %vm3077_vm0, %v3076_v0 }
  0x45   :  { %2879 = vmatpush3.msra.mxu1 %v1283_v30  ;;  %2880 = vmatprep.mubr.msk.f32.mxu1 %vm3077_vm0, %v3076_v0 }
  0x46   :  { %2876 = vmatmul.mubr.msk.f32.vlgmr.msra.gmra.mrb[14].mxu0 %vm42_vm1, %v1198_v31  ;;  %2883 = vmatprep.subr.mxu0 %v3076_v0 }
  0x47   :  { %2881 = vmatmul.mubr.msk.f32.vlgmr.msra.gmra.mrb[14].mxu1 %vm42_vm1, %v1281_v32  ;;  %2884 = vmatpush3.msra.mxu0 %v1366_v33 }
  0x48   :  { %2888 = vmatprep.subr.mxu1 %v3076_v0  ;;  %2885 = vmatprep.mubr.msk.f32.mxu0 %vm3077_vm0, %v3076_v0 }
  0x49   :  { %2889 = vmatpush3.msra.mxu1 %v1449_v34  ;;  %2890 = vmatprep.mubr.msk.f32.mxu1 %vm3077_vm0, %v3076_v0 }
  0x4a   :  { %2886 = vmatmul.mubr.msk.f32.vlgmr.msra.gmra.mrb[16].mxu0 %vm42_vm1, %v1364_v35  ;;  %2893 = vmatprep.subr.mxu0 %v3076_v0 }
  0x4b   :  { %2891 = vmatmul.mubr.msk.f32.vlgmr.msra.gmra.mrb[16].mxu1 %vm42_vm1, %v1447_v36  ;;  %2894 = vmatpush3.msra.mxu0 %v1532_v37 }
  0x4c   :  { %2898 = vmatprep.subr.mxu1 %v3076_v0  ;;  %2895 = vmatprep.mubr.msk.f32.mxu0 %vm3077_vm0, %v3076_v0 }
  0x4d   :  { %2899 = vmatpush3.msra.mxu1 %v1615_v38  ;;  %2900 = vmatprep.mubr.msk.f32.mxu1 %vm3077_vm0, %v3076_v0 }
  0x4e   :  { %2896 = vmatmul.mubr.msk.f32.vlgmr.msra.gmra.mrb[18].mxu0 %vm42_vm1, %v1530_v39  ;;  %2903 = vmatprep.subr.mxu0 %v3076_v0 }
  0x4f   :  { %2901 = vmatmul.mubr.msk.f32.vlgmr.msra.gmra.mrb[18].mxu1 %vm42_vm1, %v1613_v40  ;;  %2904 = vmatpush3.msra.mxu0 %v1698_v41 }
  0x50   :  { %2908 = vmatprep.subr.mxu1 %v3076_v0  ;;  %2905 = vmatprep.mubr.msk.f32.mxu0 %vm3077_vm0, %v3076_v0 }
  0x51   :  { %2909 = vmatpush3.msra.mxu1 %v1781_v42  ;;  %2910 = vmatprep.mubr.msk.f32.mxu1 %vm3077_vm0, %v3076_v0 }
  0x52   :  { %2906 = vmatmul.mubr.msk.f32.vlgmr.msra.gmra.mrb[20].mxu0 %vm42_vm1, %v1696_v43  ;;  %2913 = vmatprep.subr.mxu0 %v3076_v0 }
  0x53   :  { %2911 = vmatmul.mubr.msk.f32.vlgmr.msra.gmra.mrb[20].mxu1 %vm42_vm1, %v1779_v44  ;;  %2914 = vmatpush3.msra.mxu0 %v1864_v45 }
  0x54   :  { %2918 = vmatprep.subr.mxu1 %v3076_v0  ;;  %2915 = vmatprep.mubr.msk.f32.mxu0 %vm3077_vm0, %v3076_v0 }
  0x55   :  { %2919 = vmatpush3.msra.mxu1 %v1947_v46  ;;  %2920 = vmatprep.mubr.msk.f32.mxu1 %vm3077_vm0, %v3076_v0 }
  0x56   :  { %2916 = vmatmul.mubr.msk.f32.vlgmr.msra.gmra.mrb[22].mxu0 %vm42_vm1, %v1862_v47  ;;  %2923 = vmatprep.subr.mxu0 %v3076_v0 }
  0x57   :  { %2921 = vmatmul.mubr.msk.f32.vlgmr.msra.gmra.mrb[22].mxu1 %vm42_vm1, %v1945_v48  ;;  %2924 = vmatpush3.msra.mxu0 %v2030_v49 }
  0x58   :  { %2928 = vmatprep.subr.mxu1 %v3076_v0  ;;  %2925 = vmatprep.mubr.msk.f32.mxu0 %vm3077_vm0, %v3076_v0 }
  0x59   :  { %2929 = vmatpush3.msra.mxu1 %v2113_v50  ;;  %2930 = vmatprep.mubr.msk.f32.mxu1 %vm3077_vm0, %v3076_v0 }
  0x5a   :  { %2926 = vmatmul.mubr.msk.f32.vlgmr.msra.gmra.mrb[24].mxu0 %vm42_vm1, %v2028_v51  ;;  %2933 = vmatprep.subr.mxu0 %v3076_v0 }
  0x5b   :  { %2931 = vmatmul.mubr.msk.f32.vlgmr.msra.gmra.mrb[24].mxu1 %vm42_vm1, %v2111_v52  ;;  %2934 = vmatpush3.msra.mxu0 %v2196_v53 }
  0x5c   :  { %2938 = vmatprep.subr.mxu1 %v3076_v0  ;;  %2935 = vmatprep.mubr.msk.f32.mxu0 %vm3077_vm0, %v3076_v0 }
  0x5d   :  { %2939 = vmatpush3.msra.mxu1 %v2279_v54  ;;  %2940 = vmatprep.mubr.msk.f32.mxu1 %vm3077_vm0, %v3076_v0 }
  0x5e   :  { %2936 = vmatmul.mubr.msk.f32.vlgmr.msra.gmra.mrb[26].mxu0 %vm42_vm1, %v2194_v55  ;;  %2943 = vmatprep.subr.mxu0 %v3076_v0 }
  0x5f   :  { %2941 = vmatmul.mubr.msk.f32.vlgmr.msra.gmra.mrb[26].mxu1 %vm42_vm1, %v2277_v56  ;;  %2944 = vmatpush3.msra.mxu0 %v2362_v57 }
  0x60   :  { %2948 = vmatprep.subr.mxu1 %v3076_v0  ;;  %2945 = vmatprep.mubr.msk.f32.mxu0 %vm3077_vm0, %v3076_v0 }
  0x61   :  { %2949 = vmatpush3.msra.mxu1 %v2445_v58  ;;  %2950 = vmatprep.mubr.msk.f32.mxu1 %vm3077_vm0, %v3076_v0 }
  0x62   :  { %2946 = vmatmul.mubr.msk.f32.vlgmr.msra.gmra.mrb[28].mxu0 %vm42_vm1, %v2360_v59  ;;  %2953 = vmatprep.subr.mxu0 %v3076_v0 }
  0x63   :  { %2951 = vmatmul.mubr.msk.f32.vlgmr.msra.gmra.mrb[28].mxu1 %vm42_vm1, %v2443_v60  ;;  %2954 = vmatpush3.msra.mxu0 %v2528_v61 }
  0x64   :  { %2958 = vmatprep.subr.mxu1 %v3076_v0  ;;  %2955 = vmatprep.mubr.msk.f32.mxu0 %vm3077_vm0, %v3076_v0 }
  0x65   :  { %2959 = vmatpush3.msra.mxu1 %v2611_v62  ;;  %2960 = vmatprep.mubr.msk.f32.mxu1 %vm3077_vm0, %v3076_v0  ;;  %vm1278_vm0 = vcmask 490944  }
  0x66   :  { %2956 = vmatmul.mubr.msk.f32.vlgmr.msra.gmra.mrb[30].mxu0 %vm42_vm1, %v2526_v63 }
  0x67   :  { %2961 = vmatmul.mubr.msk.f32.vlgmr.msra.gmra.mrb[30].mxu1 %vm42_vm1, %v2609_v1  ;;  %vm1361_vm1 = vcmask 523744  }
  0xfd   :  { %v112_v2 = vpop.f32.mrb[0].mxu0  ;;  %v191_v3 = vpop.f32.mrb[0].mxu1 }
  0xfe   :  { %117 = vst.msk [vmem:[#allocation7] sm:$0xff] %vm116_vm2, %v112_v2  ;;  %196 = vrot.lane.b32.xlu0 %v191_v3, %s3078_s1  ;;  %v2807_v4 = vpop.f32.mrb[1].mxu0  ;;  %v2812_v5 = vpop.f32.mrb[1].mxu1  ;;  %vm1444_vm2 = vcmask 556544   ;;  %s3108_s1 = smov [#allocation7]  }
 0x101   :  { %v274_v6 = vpop.f32.mrb[2].mxu0  ;;  %v357_v7 = vpop.f32.mrb[2].mxu1 }
 0x102   :  { %v2822_v8 = vpop.f32.mrb[3].mxu1  ;;  %279 = vrot.lane.b32.xlu0 %v274_v6, %s3074_s20  ;;  %v2817_v9 = vpop.f32.mrb[3].mxu0  ;;  %362 = vrot.lane.b32.xlu1 %v357_v7, %s3079_s6  ;;  %s3093_s20 = smov 68   ;;  %s2697_s6 = sshll.u32 %s3108_s1, 4  ;;  %s2698_s6 = int_to_ptr.vmem [resolvable:$true] %s2697_s6 }
 0x103   :  { %p3049_p3 = scmp.lt.s32.totalorder %s2698_s6, %s2698_s6 }
 0x105   :  { %v440_v0 = vpop.f32.mrb[4].mxu0 }
 0x106   :  { %v2827_v10 = vpop.f32.mrb[5].mxu0  ;;  %v523_v11 = vpop.f32.mrb[4].mxu1  ;;  %445 = vrot.lane.b32.xlu1 %v440_v0, %s3080_s7  ;;  %s3044_s7 = scalar_lea.vmem %s2698_s6, 128 }
 0x107   :  { %v2832_v12 = vpop.f32.mrb[5].mxu1  ;;  %528 = vrot.lane.b32.xlu0 %v523_v11, %s3081_s8  ;;  %p3045_p2 = scmp.ne.s32.totalorder %s2698_s6, %s3044_s7  ;;  %p3050_p4 = scmp.lt.s32.totalorder %s3044_s7, %s3044_s7 }
 0x109   :  { %v606_v13 = vpop.f32.mrb[6].mxu0  ;;  %p3051_p5 = por %p3050_p4, %p3049_p3 }
 0x10a   :  { %v2837_v14 = vpop.f32.mrb[7].mxu0  ;;  %v689_v15 = vpop.f32.mrb[6].mxu1  ;;  %611 = vrot.lane.b32.xlu1 %v606_v13, %s3082_s9 }
 0x10b   :  { %v2842_v16 = vpop.f32.mrb[7].mxu1  ;;  %694 = vrot.lane.b32.xlu0 %v689_v15, %s3083_s10  ;;  %p3052_p6 = pnand %p3051_p5, %p3045_p2 }
 0x10d   :  { %v772_v17 = vpop.f32.mrb[8].mxu0 }
 0x10e   :  { %v2847_v18 = vpop.f32.mrb[9].mxu0  ;;  %v855_v19 = vpop.f32.mrb[8].mxu1  ;;  %777 = vrot.lane.b32.xlu1 %v772_v17, %s3084_s11 }
 0x10f   :  { %v2852_v20 = vpop.f32.mrb[9].mxu1  ;;  %860 = vrot.lane.b32.xlu0 %v855_v19, %s3085_s12 }
 0x111   :  { %v938_v21 = vpop.f32.mrb[10].mxu0 }
 0x112   :  { %v2857_v22 = vpop.f32.mrb[11].mxu0  ;;  %v1021_v23 = vpop.f32.mrb[10].mxu1  ;;  %943 = vrot.lane.b32.xlu1 %v938_v21, %s3086_s13 }
 0x113   :  { %v2862_v24 = vpop.f32.mrb[11].mxu1  ;;  %1026 = vrot.lane.b32.xlu0 %v1021_v23, %s3087_s14 }
 0x115   :  { %v1104_v25 = vpop.f32.mrb[12].mxu0 }
 0x116   :  { %v2867_v26 = vpop.f32.mrb[13].mxu0  ;;  %v1187_v27 = vpop.f32.mrb[12].mxu1  ;;  %1109 = vrot.lane.b32.xlu1 %v1104_v25, %s3088_s15 }
 0x117   :  { %v2872_v28 = vpop.f32.mrb[13].mxu1  ;;  %1192 = vrot.lane.b32.xlu0 %v1187_v27, %s3089_s16 }
 0x119   :  { %v1270_v29 = vpop.f32.mrb[14].mxu0 }
 0x11a   :  { %v2877_v30 = vpop.f32.mrb[15].mxu0  ;;  %v1353_v31 = vpop.f32.mrb[14].mxu1  ;;  %1275 = vrot.lane.b32.xlu1 %v1270_v29, %s3090_s17 }
 0x11b   :  { %v2882_v32 = vpop.f32.mrb[15].mxu1  ;;  %1358 = vrot.lane.b32.xlu0 %v1353_v31, %s3091_s18 }
 0x11d   :  { %v1436_v33 = vpop.f32.mrb[16].mxu0 }
 0x11e   :  { %v2887_v34 = vpop.f32.mrb[17].mxu0  ;;  %v1519_v35 = vpop.f32.mrb[16].mxu1  ;;  %1441 = vrot.lane.b32.xlu1 %v1436_v33, %s3092_s19 }
 0x11f   :  { %v2892_v36 = vpop.f32.mrb[17].mxu1  ;;  %1524 = vrot.lane.b32.xlu0 %v1519_v35, %s3093_s20 }
 0x121   :  { %v1602_v37 = vpop.f32.mrb[18].mxu0 }
 0x122   :  { %v2897_v38 = vpop.f32.mrb[19].mxu0  ;;  %v1685_v39 = vpop.f32.mrb[18].mxu1  ;;  %1607 = vrot.lane.b32.xlu1 %v1602_v37, %s3094_s21 }
 0x123   :  { %v2902_v40 = vpop.f32.mrb[19].mxu1  ;;  %1690 = vrot.lane.b32.xlu0 %v1685_v39, %s3095_s22 }
 0x125   :  { %v1768_v41 = vpop.f32.mrb[20].mxu0 }
 0x126   :  { %v2907_v42 = vpop.f32.mrb[21].mxu0  ;;  %v1851_v43 = vpop.f32.mrb[20].mxu1  ;;  %1773 = vrot.lane.b32.xlu1 %v1768_v41, %s3096_s23 }
 0x127   :  { %v2912_v44 = vpop.f32.mrb[21].mxu1  ;;  %1856 = vrot.lane.b32.xlu0 %v1851_v43, %s3097_s24 }
 0x129   :  { %v1934_v45 = vpop.f32.mrb[22].mxu0 }
 0x12a   :  { %v2917_v46 = vpop.f32.mrb[23].mxu0  ;;  %v2017_v47 = vpop.f32.mrb[22].mxu1  ;;  %1939 = vrot.lane.b32.xlu1 %v1934_v45, %s3098_s25 }
 0x12b   :  { %v2922_v48 = vpop.f32.mrb[23].mxu1  ;;  %2022 = vrot.lane.b32.xlu0 %v2017_v47, %s3099_s26 }
 0x12d   :  { %v2100_v49 = vpop.f32.mrb[24].mxu0 }
 0x12e   :  { %v2927_v50 = vpop.f32.mrb[25].mxu0  ;;  %v2183_v51 = vpop.f32.mrb[24].mxu1  ;;  %2105 = vrot.lane.b32.xlu1 %v2100_v49, %s3100_s27 }
 0x12f   :  { %v2932_v52 = vpop.f32.mrb[25].mxu1  ;;  %2188 = vrot.lane.b32.xlu0 %v2183_v51, %s3101_s28 }
 0x131   :  { %v2266_v53 = vpop.f32.mrb[26].mxu0 }
 0x132   :  { %v2937_v54 = vpop.f32.mrb[27].mxu0  ;;  %v2349_v55 = vpop.f32.mrb[26].mxu1  ;;  %2271 = vrot.lane.b32.xlu1 %v2266_v53, %s3102_s29 }
 0x133   :  { %v2942_v56 = vpop.f32.mrb[27].mxu1  ;;  %2354 = vrot.lane.b32.xlu0 %v2349_v55, %s3103_s30 }
 0x135   :  { %v2432_v57 = vpop.f32.mrb[28].mxu0 }
 0x136   :  { %v2947_v58 = vpop.f32.mrb[29].mxu0  ;;  %v2515_v59 = vpop.f32.mrb[28].mxu1  ;;  %2437 = vrot.lane.b32.xlu1 %v2432_v57, %s3104_s3 }
 0x137   :  { %v2952_v60 = vpop.f32.mrb[29].mxu1  ;;  %2520 = vrot.lane.b32.xlu0 %v2515_v59, %s3105_s4 }
 0x139   :  { %v2598_v61 = vpop.f32.mrb[30].mxu0 }
 0x13a   :  { %v2957_v62 = vpop.f32.mrb[31].mxu0  ;;  %v2681_v63 = vpop.f32.mrb[30].mxu1  ;;  %2603 = vrot.lane.b32.xlu1 %v2598_v61, %s3106_s0 }
 0x13b   :  { %v2962_v1 = vpop.f32.mrb[31].mxu1  ;;  %2686 = vrot.lane.b32.xlu0 %v2681_v63, %s3107_s5 }
 0x170   :  { %v197_v2 = vpop.permute.xlu0 %196 }
 0x171   :  { %200 = vst.msk [vmem:[#allocation7] sm:$0xff] %vm199_vm3, %v197_v2  ;;  %vm1527_vm3 = vcmask 589344  }
 0x174   :  { %v280_v3 = vpop.permute.xlu0 %279  ;;  %v363_v4 = vpop.permute.xlu1 %362 }
 0x175   :  { %283 = vst.msk [vmem:[#allocation7] sm:$0xff] %vm282_vm4, %v280_v3  ;;  %vm1610_vm4 = vcmask 622144  }
 0x176   :  { %366 = vst.msk [vmem:[#allocation7] sm:$0xff] %vm365_vm5, %v363_v4  ;;  %vm1693_vm5 = vcmask 654944  }
 0x178   :  { %v446_v5 = vpop.permute.xlu1 %445 }
 0x179   :  { %449 = vst.msk [vmem:[#allocation7] sm:$0xff] %vm448_vm6, %v446_v5  ;;  %v529_v6 = vpop.permute.xlu0 %528  ;;  %vm1776_vm6 = vcmask 687744  }
 0x17a   :  { %532 = vst.msk [vmem:[#allocation7] sm:$0xff] %vm531_vm7, %v529_v6  ;;  %vm1859_vm7 = vcmask 720544  }
 0x17c   :  { %v612_v7 = vpop.permute.xlu1 %611 }
 0x17d   :  { %615 = vst.msk [vmem:[#allocation7] sm:$0xff] %vm614_vm8, %v612_v7  ;;  %v695_v8 = vpop.permute.xlu0 %694  ;;  %vm1942_vm8 = vcmask 753344  }
 0x17e   :  { %698 = vst.msk [vmem:[#allocation7] sm:$0xff] %vm697_vm9, %v695_v8  ;;  %vm2025_vm9 = vcmask 786144  }
 0x180   :  { %v778_v9 = vpop.permute.xlu1 %777 }
 0x181   :  { %781 = vst.msk [vmem:[#allocation7] sm:$0xff] %vm780_vm10, %v778_v9  ;;  %v861_v0 = vpop.permute.xlu0 %860  ;;  %vm2108_vm10 = vcmask 818944  }
 0x182   :  { %864 = vst.msk [vmem:[#allocation7] sm:$0xff] %vm863_vm11, %v861_v0  ;;  %vm2191_vm11 = vcmask 851744  }
 0x184   :  { %v944_v10 = vpop.permute.xlu1 %943 }
 0x185   :  { %947 = vst.msk [vmem:[#allocation7] sm:$0xff] %vm946_vm12, %v944_v10  ;;  %v1027_v11 = vpop.permute.xlu0 %1026  ;;  %vm2274_vm12 = vcmask 884544  }
 0x186   :  { %1030 = vst.msk [vmem:[#allocation7] sm:$0xff] %vm1029_vm13, %v1027_v11  ;;  %vm2357_vm13 = vcmask 917344  }
 0x188   :  { %v1110_v12 = vpop.permute.xlu1 %1109 }
 0x189   :  { %1113 = vst.msk [vmem:[#allocation7] sm:$0xff] %vm1112_vm14, %v1110_v12  ;;  %v1193_v13 = vpop.permute.xlu0 %1192  ;;  %vm2440_vm14 = vcmask 950144  }
 0x18a   :  { %1196 = vst.msk [vmem:[#allocation7] sm:$0xff] %vm1195_vm15, %v1193_v13  ;;  %vm2523_vm15 = vcmask 982944  }
 0x18c   :  { %v1276_v14 = vpop.permute.xlu1 %1275 }
 0x18d   :  { %1279 = vst.msk [vmem:[#allocation7] sm:$0xff] %vm1278_vm0, %v1276_v14  ;;  %v1359_v15 = vpop.permute.xlu0 %1358  ;;  %vm2606_vm0 = vcmask 1015744  }
 0x18e   :  { %1362 = vst.msk [vmem:[#allocation7] sm:$0xff] %vm1361_vm1, %v1359_v15  ;;  %vm2689_vm1 = vcmask 1048544  }
 0x190   :  { %v1442_v16 = vpop.permute.xlu1 %1441 }
 0x191   :  { %1445 = vst.msk [vmem:[#allocation7] sm:$0xff] %vm1444_vm2, %v1442_v16  ;;  %v1525_v17 = vpop.permute.xlu0 %1524 }
 0x192   :  { %1528 = vst.msk [vmem:[#allocation7] sm:$0xff] %vm1527_vm3, %v1525_v17 }
 0x194   :  { %v1608_v18 = vpop.permute.xlu1 %1607 }
 0x195   :  { %1611 = vst.msk [vmem:[#allocation7] sm:$0xff] %vm1610_vm4, %v1608_v18  ;;  %v1691_v19 = vpop.permute.xlu0 %1690 }
 0x196   :  { %1694 = vst.msk [vmem:[#allocation7] sm:$0xff] %vm1693_vm5, %v1691_v19 }
 0x198   :  { %v1774_v20 = vpop.permute.xlu1 %1773 }
 0x199   :  { %1777 = vst.msk [vmem:[#allocation7] sm:$0xff] %vm1776_vm6, %v1774_v20  ;;  %v1857_v21 = vpop.permute.xlu0 %1856 }
 0x19a   :  { %1860 = vst.msk [vmem:[#allocation7] sm:$0xff] %vm1859_vm7, %v1857_v21 }
 0x19c   :  { %v1940_v22 = vpop.permute.xlu1 %1939 }
 0x19d   :  { %1943 = vst.msk [vmem:[#allocation7] sm:$0xff] %vm1942_vm8, %v1940_v22  ;;  %v2023_v23 = vpop.permute.xlu0 %2022 }
 0x19e   :  { %2026 = vst.msk [vmem:[#allocation7] sm:$0xff] %vm2025_vm9, %v2023_v23 }
 0x1a0   :  { %v2106_v24 = vpop.permute.xlu1 %2105 }
 0x1a1   :  { %2109 = vst.msk [vmem:[#allocation7] sm:$0xff] %vm2108_vm10, %v2106_v24  ;;  %v2189_v25 = vpop.permute.xlu0 %2188 }
 0x1a2   :  { %2192 = vst.msk [vmem:[#allocation7] sm:$0xff] %vm2191_vm11, %v2189_v25 }
 0x1a4   :  { %v2272_v26 = vpop.permute.xlu1 %2271 }
 0x1a5   :  { %2275 = vst.msk [vmem:[#allocation7] sm:$0xff] %vm2274_vm12, %v2272_v26  ;;  %v2355_v27 = vpop.permute.xlu0 %2354 }
 0x1a6   :  { %2358 = vst.msk [vmem:[#allocation7] sm:$0xff] %vm2357_vm13, %v2355_v27 }
 0x1a8   :  { %v2438_v28 = vpop.permute.xlu1 %2437 }
 0x1a9   :  { %2441 = vst.msk [vmem:[#allocation7] sm:$0xff] %vm2440_vm14, %v2438_v28  ;;  %v2521_v29 = vpop.permute.xlu0 %2520 }
 0x1aa   :  { %2524 = vst.msk [vmem:[#allocation7] sm:$0xff] %vm2523_vm15, %v2521_v29 }
 0x1ac   :  { %v2604_v30 = vpop.permute.xlu1 %2603 }
 0x1ad   :  { %2607 = vst.msk [vmem:[#allocation7] sm:$0xff] %vm2606_vm0, %v2604_v30  ;;  %v2687_v31 = vpop.permute.xlu0 %2686 }
 0x1ae   :  { %2690 = vst.msk [vmem:[#allocation7] sm:$0xff] %vm2689_vm1, %v2687_v31 }
 0x1af   :  { %3055 = shalt.err (!%p3052_p6)
}
 0x1b0   :  { %s3056_s10 = scalar_lea.hbm %s3293_s2, 128 }
 0x1b1   :  { %p3057_p7 = scmp.ne.s32.totalorder %s3293_s2, %s3056_s10  ;;  %p3060_p8 = scmp.lt.u32.totalorder %s3056_s10, %s3293_s2 }
 0x1b3   :  { %p3062_p9 = pnand %p3060_p8, %p3057_p7 }
 0x1b5   :  { %3065 = shalt.err (!%p3062_p9)
}
 0x1b6   :  { %2700 = dma.vmem_to_hbm [thread:$0]  %s2698_s6, 128, %s3293_s2, [#allocation4]  }
 0x1b7   :  { %3070 = dma.done.wait [#allocation4], 128  }
 0x1b8   :  { %3071 = vsyncadd [#allocation4], 4294967168 }
 0x1b9   :  { %2704 = vsyncpa [#allocation3], 1 }
 0x1ba   :  { %2705 = vsyncpa [#allocation6], 1 }
 0x1bb   :  { %2706 = vsyncpa [#allocation4], 1 }

</bundles_post_ra>
